<compile_context>
chip_gen: v6e
topology: v6e:2x2x1
jax: 0.10.0
libtpu: 0.0.40
codegen_flags: <defaults>
</compile_context>

<pallas_src>
import functools

import jax
import jax.numpy as jnp
from jax import lax
from jax.experimental import pallas as pl
from jax.experimental.pallas import tpu as pltpu

EPS = 1e-5     # nn.BatchNorm2d default
LANE = 128     # TPU lane width


# ---------------------------------------------------------------- kernel ----

def _make_resblk_kernel(stride, Ho, Wo, c_in, c_op, chunks):
    """Fused ResBlk kernel body (all shape params are static Python ints)."""
    n_phase = stride * stride
    # shortcut input pixel (i, j) is x[stride*i, stride*j] == padded image at
    # (stride*i + 1, stride*j + 1) -> phase / offset below (works for s=1, 2).
    sc_ph = (1 % stride) * stride + (1 % stride)
    sc_off = 1 // stride

    def kernel(*refs):
        i = 0
        phase_refs = refs[i:i + n_phase]; i += n_phase   # (Ho+e, Wo+e, c_in) bf16
        w1_ref = refs[i]; i += 1                         # (9, c_in, c_op) bf16
        sh1_ref = refs[i]; i += 1                        # (1, c_op) f32
        w2_ref = refs[i]; i += 1                         # (9*c_op, c_op) bf16
        sh2_ref = refs[i]; i += 1                        # (1, c_op) f32 (bn2 [+ bn_sc])
        wsc_ref = refs[i]; i += 1                        # (c_in, c_op) bf16 (1x1 / eye)
        out_ref = refs[i]; i += 1                        # (M, c_op) f32
        hpad_ref = refs[i]; i += 1                       # VMEM (Ho+2, Wo+2, c_op) bf16

        # ---- zero ONLY the 1-pixel halo border of the conv1-output scratch --
        # (the interior is fully rewritten below; done every step so that it
        #  remains correct when megacore splits the batch grid axis).
        zrow = jnp.zeros((1, Wo + 2, c_op), hpad_ref.dtype)
        zcol = jnp.zeros((Ho + 2, 1, c_op), hpad_ref.dtype)
        hpad_ref[0:1, :, :] = zrow
        hpad_ref[Ho + 1:Ho + 2, :, :] = zrow
        hpad_ref[:, 0:1, :] = zcol
        hpad_ref[:, Wo + 1:Wo + 2, :] = zcol

        # ---- conv1 (3x3, stride s) + folded BN1 + ReLU, per row chunk -------
        # phase (p, q) holds x_padded[p::s, q::s]; tap (kh, kw) reads phase
        # (kh % s, kw % s) at static offset (kh // s, kw // s).
        for r0, rows in chunks:
            mc = rows * Wo
            acc1 = jnp.zeros((mc, c_op), jnp.float32)
            for kh in range(3):
                for kw in range(3):
                    pr = phase_refs[(kh % stride) * stride + (kw % stride)]
                    rr = r0 + kh // stride
                    cc = kw // stride
                    tap = pr[rr:rr + rows, cc:cc + Wo, :].reshape(mc, c_in)
                    acc1 = acc1 + jnp.dot(tap, w1_ref[kh * 3 + kw],
                                          preferred_element_type=jnp.float32)
            h = jnp.maximum(acc1 + sh1_ref[...], 0.0)        # (mc, c_op) f32
            # NOTE: h staged in bf16 (matches the MXU LHS precision of conv2).
            hpad_ref[1 + r0:1 + r0 + rows, 1:1 + Wo, :] = (
                h.reshape(rows, Wo, c_op).astype(hpad_ref.dtype))

        # ---- conv2 (3x3, s=1) + folded BN2 + shortcut + residual add --------
        for r0, rows in chunks:
            mc = rows * Wo
            # in-VMEM im2col: 9 lane-aligned (mc, c_op) taps -> one K=9*c_op dot
            taps = [hpad_ref[r0 + kh:r0 + kh + rows, kw:kw + Wo, :].reshape(mc, c_op)
                    for kh in range(3) for kw in range(3)]
            lhs2 = jnp.concatenate(taps, axis=-1)            # (mc, 9*c_op) bf16
            acc2 = jnp.dot(lhs2, w2_ref[...],
                           preferred_element_type=jnp.float32)

            # shortcut input comes straight from the phases already in VMEM
            # (no separate HBM stream).  Identity uses a padded-eye weight.
            xs = phase_refs[sc_ph][r0 + sc_off:r0 + sc_off + rows,
                                   sc_off:sc_off + Wo, :].reshape(mc, c_in)
            sc = jnp.dot(xs, wsc_ref[...], preferred_element_type=jnp.float32)

            out_ref[r0 * Wo:r0 * Wo + mc, :] = (
                acc2 + sc + sh2_ref[...]).astype(out_ref.dtype)

    return kernel


# ------------------------------------------------------------------- glue ---

def fold_bn(w_hwio, conv_b, gamma, beta, mean, var):
    # BN(conv(x) + b) == conv_{w*scale}(x) + (beta + (b - mean) * scale)
    scale = gamma / jnp.sqrt(var + EPS)
    return w_hwio * scale[None, None, None, :], beta + (conv_b - mean) * scale


def _pad_last(a, target):
    pad = target - a.shape[-1]
    if pad == 0:
        return a
    return jnp.pad(a, [(0, 0)] * (a.ndim - 1) + [(0, pad)])


@functools.partial(jax.jit, static_argnums=(2, 3, 4))
def resblk_forward(x_nchw, p, ch_in, ch_out, stride):
    x = jnp.transpose(x_nchw, (0, 2, 3, 1)).astype(jnp.float32)   # NHWC
    N, H, W, _ = x.shape
    Ho = (H - 1) // stride + 1
    Wo = (W - 1) // stride + 1
    M = Ho * Wo
    c_op = ((ch_out + LANE - 1) // LANE) * LANE      # lane-dense output channels
    use_proj = ch_in != ch_out
    if not use_proj:
        assert stride == 1, "identity shortcut requires stride=1 (as in PyTorch)"

    # ---- fold BN (inference) into conv weights; pad out-channels to c_op ----
    w1, sh1 = fold_bn(p['w1'], p['b1'], p['g1'], p['be1'], p['m1'], p['v1'])
    w2, sh2 = fold_bn(p['w2'], p['b2'], p['g2'], p['be2'], p['m2'], p['v2'])
    w1 = _pad_last(w1, c_op).reshape(9, ch_in, c_op).astype(jnp.bfloat16)
    w2 = _pad_last(w2, c_op)                                     # (3,3,ch_out,c_op)
    w2 = jnp.pad(w2, ((0, 0), (0, 0), (0, c_op - ch_out), (0, 0)))
    w2 = w2.reshape(9 * c_op, c_op).astype(jnp.bfloat16)         # im2col RHS
    sh1 = _pad_last(sh1, c_op).reshape(1, c_op)
    sh2 = _pad_last(sh2, c_op).reshape(1, c_op)

    if use_proj:
        wsc, shsc = fold_bn(p['wsc'], p['bsc'], p['gsc'], p['besc'],
                            p['msc'], p['vsc'])
        wsc = _pad_last(wsc.reshape(ch_in, ch_out), c_op).astype(jnp.bfloat16)
        sh_total = sh2 + _pad_last(shsc, c_op).reshape(1, c_op)
    else:
        # identity shortcut as a zero-padded identity 1x1 "projection":
        # unifies the code path and avoids an HBM channel-padded x stream.
        wsc = _pad_last(jnp.eye(ch_in, dtype=jnp.float32), c_op).astype(jnp.bfloat16)
        sh_total = sh2

    # ---- space-to-depth "phase" decomposition of the zero-padded input ------
    # (stride=1 -> one phase = the padded image; no data expansion either way)
    ext = 2 // stride
    hp_req = stride * (Ho + ext)
    wp_req = stride * (Wo + ext)
    xp = jnp.pad(x, ((0, 0), (1, hp_req - H - 1), (1, wp_req - W - 1), (0, 0)))
    phases = []
    for ph in range(stride):
        for qw in range(stride):
            phases.append(
                xp[:, ph::stride, qw::stride, :][:, :Ho + ext, :Wo + ext, :]
                .astype(jnp.bfloat16))

    # ---- static row chunking (~256 output rows of M per chunk) --------------
    TH = max(1, min(Ho, 256 // max(1, Wo)))
    chunks = tuple((r0, min(TH, Ho - r0)) for r0 in range(0, Ho, TH))

    # ---- one fused pallas_call over the batch --------------------------------
    kernel = _make_resblk_kernel(stride, Ho, Wo, ch_in, c_op, chunks)

    in_specs = [pl.BlockSpec((None, Ho + ext, Wo + ext, ch_in),
                             lambda n: (n, 0, 0, 0)) for _ in phases]
    in_specs += [pl.BlockSpec((9, ch_in, c_op), lambda n: (0, 0, 0)),   # w1
                 pl.BlockSpec((1, c_op), lambda n: (0, 0)),             # sh1
                 pl.BlockSpec((9 * c_op, c_op), lambda n: (0, 0)),      # w2
                 pl.BlockSpec((1, c_op), lambda n: (0, 0)),             # sh2
                 pl.BlockSpec((ch_in, c_op), lambda n: (0, 0))]         # wsc/eye
    inputs = list(phases) + [w1, sh1, w2, sh_total, wsc]

    out = pl.pallas_call(
        kernel,
        out_shape=jax.ShapeDtypeStruct((N, M, c_op), jnp.float32),
        grid=(N,),
        in_specs=in_specs,
        out_specs=pl.BlockSpec((None, M, c_op), lambda n: (n, 0, 0)),
        scratch_shapes=[pltpu.VMEM((Ho + 2, Wo + 2, c_op), jnp.bfloat16)],
        compiler_params=pltpu.CompilerParams(
            dimension_semantics=("parallel",),
            # safe on all generations at these shapes; raise (~64-100 MiB) on
            # v6e once ResNet-scale row tiling is added.
            vmem_limit_bytes=32 * 1024 * 1024),
    )(*inputs)

    out = out.reshape(N, Ho, Wo, c_op)[..., :ch_out]
    return jnp.transpose(out, (0, 3, 1, 2))              # back to NCHW


# -------------------------------------------------------- reference (JAX) ---

def ref_resblk(x_nchw, p, ch_in, ch_out, stride):
    x = jnp.transpose(x_nchw, (0, 2, 3, 1)).astype(jnp.float32)

    def conv(y, w, b, s, pad):
        y = lax.conv_general_dilated(y, w, (s, s), ((pad, pad), (pad, pad)),
                                     dimension_numbers=('NHWC', 'HWIO', 'NHWC'))
        return y + b

    def bn(y, g, be, m, v):
        return (y - m) / jnp.sqrt(v + EPS) * g + be

    h = jax.nn.relu(bn(conv(x, p['w1'], p['b1'], stride, 1),
                       p['g1'], p['be1'], p['m1'], p['v1']))
    out = bn(conv(h, p['w2'], p['b2'], 1, 1),
             p['g2'], p['be2'], p['m2'], p['v2'])
    if ch_in != ch_out:
        sc = bn(conv(x, p['wsc'], p['bsc'], stride, 0),
                p['gsc'], p['besc'], p['msc'], p['vsc'])
    else:
        sc = x
    return jnp.transpose(out + sc, (0, 3, 1, 2))


# ----------------------------------------------------------------- params ---

def init_params(key, ch_in, ch_out):
    ks = jax.random.split(key, 18)
    f32 = jnp.float32

    def bn_params(k0, k1, k2, k3, c):
        return (1.0 + 0.1 * jax.random.normal(k0, (c,), f32),
                0.1 * jax.random.normal(k1, (c,), f32),
                0.1 * jax.random.normal(k2, (c,), f32),
                0.5 + jnp.abs(jax.random.normal(k3, (c,), f32)))

    p = {}
    p['w1'] = 0.1 * jax.random.normal(ks[0], (3, 3, ch_in, ch_out), f32)
    p['b1'] = 0.1 * jax.random.normal(ks[1], (ch_out,), f32)
    p['g1'], p['be1'], p['m1'], p['v1'] = bn_params(ks[2], ks[3], ks[4], ks[5], ch_out)
    p['w2'] = 0.1 * jax.random.normal(ks[6], (3, 3, ch_out, ch_out), f32)
    p['b2'] = 0.1 * jax.random.normal(ks[7], (ch_out,), f32)
    p['g2'], p['be2'], p['m2'], p['v2'] = bn_params(ks[8], ks[9], ks[10], ks[11], ch_out)
    p['wsc'] = 0.1 * jax.random.normal(ks[12], (1, 1, ch_in, ch_out), f32)
    p['bsc'] = 0.1 * jax.random.normal(ks[13], (ch_out,), f32)
    p['gsc'], p['besc'], p['msc'], p['vsc'] = bn_params(ks[14], ks[15], ks[16], ks[17], ch_out)
    return p


if __name__ == "__main__":
    key = jax.random.PRNGKey(0)
    k1, k2, k3, k4 = jax.random.split(key, 4)

    # Case 1: projection shortcut (ch_in != ch_out), stride 2.
    x1 = jax.random.normal(k1, (2, 4, 16, 16), jnp.float32)       # NCHW
    p1 = init_params(k2, 4, 8)
    out1 = jax.block_until_ready(resblk_forward(x1, p1, 4, 8, 2))
    ref1 = jax.block_until_ready(ref_resblk(x1, p1, 4, 8, 2))
    assert out1.shape == ref1.shape == (2, 8, 8, 8)
    assert jnp.allclose(out1, ref1, atol=2e-2, rtol=2e-2), \
        f"case1 max abs err {jnp.max(jnp.abs(out1 - ref1))}"

    # Case 2: identity shortcut (ch_in == ch_out), stride 1.
    x2 = jax.random.normal(k3, (2, 8, 16, 16), jnp.float32)
    p2 = init_params(k4, 8, 8)
    out2 = jax.block_until_ready(resblk_forward(x2, p2, 8, 8, 1))
    ref2 = jax.block_until_ready(ref_resblk(x2, p2, 8, 8, 1))
    assert out2.shape == ref2.shape == (2, 8, 16, 16)
    assert jnp.allclose(out2, ref2, atol=2e-2, rtol=2e-2), \
        f"case2 max abs err {jnp.max(jnp.abs(out2 - ref2))}"

    print("KERNEL_OK")
</pallas_src>

<mosaic_0001>
module attributes {stable_mosaic.version = 11 : i64} {
  func.func @kernel(%arg0: i32, %arg1: memref<1x9x9x4xbf16, #tpu.memory_space<vmem>>, %arg2: memref<1x9x9x4xbf16, #tpu.memory_space<vmem>>, %arg3: memref<1x9x9x4xbf16, #tpu.memory_space<vmem>>, %arg4: memref<1x9x9x4xbf16, #tpu.memory_space<vmem>>, %arg5: memref<9x4x128xbf16, #tpu.memory_space<vmem>>, %arg6: memref<1x128xf32, #tpu.memory_space<vmem>>, %arg7: memref<1152x128xbf16, #tpu.memory_space<vmem>>, %arg8: memref<1x128xf32, #tpu.memory_space<vmem>>, %arg9: memref<4x128xbf16, #tpu.memory_space<vmem>>, %arg10: memref<1x64x128xf32, #tpu.memory_space<vmem>>, %arg11: memref<10x10x128xbf16, #tpu.memory_space<vmem>>) attributes {dimension_semantics = [#tpu.dimension_semantics<parallel>], iteration_bounds = array<i64: 2>, scalar_prefetch = 0 : i64, scratch_operands = 1 : i64, tpu.core_type = #tpu.core_type<tc>, window_params = [{transform_indices = @transform_0, window_bounds = array<i64: 1, 9, 9, 4>}, {transform_indices = @transform_1, window_bounds = array<i64: 1, 9, 9, 4>}, {transform_indices = @transform_2, window_bounds = array<i64: 1, 9, 9, 4>}, {transform_indices = @transform_3, window_bounds = array<i64: 1, 9, 9, 4>}, {pipeline_mode = #tpu.pipeline_mode<synchronous>, transform_indices = @transform_4, window_bounds = array<i64: 9, 4, 128>}, {pipeline_mode = #tpu.pipeline_mode<synchronous>, transform_indices = @transform_5, window_bounds = array<i64: 1, 128>}, {pipeline_mode = #tpu.pipeline_mode<synchronous>, transform_indices = @transform_6, window_bounds = array<i64: 1152, 128>}, {pipeline_mode = #tpu.pipeline_mode<synchronous>, transform_indices = @transform_7, window_bounds = array<i64: 1, 128>}, {pipeline_mode = #tpu.pipeline_mode<synchronous>, transform_indices = @transform_8, window_bounds = array<i64: 4, 128>}, {transform_indices = @transform_9, window_bounds = array<i64: 1, 64, 128>}]} {
    %cst = arith.constant 0.000000e+00 : bf16
    %0 = vector.broadcast %cst : bf16 to vector<1x10x128xbf16>
    %cst_0 = arith.constant 0.000000e+00 : bf16
    %1 = vector.broadcast %cst_0 : bf16 to vector<10x1x128xbf16>
    %c0 = arith.constant 0 : index
    %c0_1 = arith.constant 0 : index
    %c0_2 = arith.constant 0 : index
    %2 = vector.load %arg11[%c0, %c0_1, %c0_2] : memref<10x10x128xbf16, #tpu.memory_space<vmem>>, vector<1x10x128xbf16>
    tpu.vector_store %arg11[%c0, %c0_1, %c0_2], %0 {strides = array<i32>} : memref<10x10x128xbf16, #tpu.memory_space<vmem>>, vector<1x10x128xbf16>,
    %c9 = arith.constant 9 : index
    %c0_3 = arith.constant 0 : index
    %c0_4 = arith.constant 0 : index
    %3 = vector.load %arg11[%c9, %c0_3, %c0_4] : memref<10x10x128xbf16, #tpu.memory_space<vmem>>, vector<1x10x128xbf16>
    tpu.vector_store %arg11[%c9, %c0_3, %c0_4], %0 {strides = array<i32>} : memref<10x10x128xbf16, #tpu.memory_space<vmem>>, vector<1x10x128xbf16>,
    %c0_5 = arith.constant 0 : index
    %c0_6 = arith.constant 0 : index
    %c0_7 = arith.constant 0 : index
    %4 = vector.load %arg11[%c0_5, %c0_6, %c0_7] : memref<10x10x128xbf16, #tpu.memory_space<vmem>>, vector<10x1x128xbf16>
    tpu.vector_store %arg11[%c0_5, %c0_6, %c0_7], %1 {strides = array<i32>} : memref<10x10x128xbf16, #tpu.memory_space<vmem>>, vector<10x1x128xbf16>,
    %c0_8 = arith.constant 0 : index
    %c9_9 = arith.constant 9 : index
    %c0_10 = arith.constant 0 : index
    %5 = vector.load %arg11[%c0_8, %c9_9, %c0_10] : memref<10x10x128xbf16, #tpu.memory_space<vmem>>, vector<10x1x128xbf16>
    tpu.vector_store %arg11[%c0_8, %c9_9, %c0_10], %1 {strides = array<i32>} : memref<10x10x128xbf16, #tpu.memory_space<vmem>>, vector<10x1x128xbf16>,
    %cst_11 = arith.constant 0.000000e+00 : f32
    %6 = vector.broadcast %cst_11 : f32 to vector<64x128xf32>
    %c0_12 = arith.constant 0 : index
    %c0_13 = arith.constant 0 : index
    %c0_14 = arith.constant 0 : index
    %c0_15 = arith.constant 0 : index
    %7 = vector.load %arg1[%c0_12, %c0_13, %c0_14, %c0_15] : memref<1x9x9x4xbf16, #tpu.memory_space<vmem>>, vector<1x8x8x4xbf16>
    %8 = vector.shape_cast %7 : vector<1x8x8x4xbf16> to vector<8x8x4xbf16>
    %9 = vector.shape_cast %8 : vector<8x8x4xbf16> to vector<64x4xbf16>
    %c0_16 = arith.constant 0 : index
    %c0_17 = arith.constant 0 : index
    %c0_18 = arith.constant 0 : index
    %10 = vector.load %arg5[%c0_16, %c0_17, %c0_18] : memref<9x4x128xbf16, #tpu.memory_space<vmem>>, vector<1x4x128xbf16>
    %11 = vector.shape_cast %10 : vector<1x4x128xbf16> to vector<4x128xbf16>
    %cst_19 = arith.constant dense<0.000000e+00> : vector<64x128xf32>
    %12 = tpu.matmul %9, %11, %cst_19 {dimension_numbers = #tpu.dot_dimension_numbers<[1], [0], [0], [1], [0, 0, 1, 1], [], []>} : vector<64x4xbf16>, vector<4x128xbf16>, vector<64x128xf32> -> vector<64x128xf32>
    %13 = arith.addf %6, %12 : vector<64x128xf32>
    %c0_20 = arith.constant 0 : index
    %c0_21 = arith.constant 0 : index
    %c0_22 = arith.constant 0 : index
    %c0_23 = arith.constant 0 : index
    %14 = vector.load %arg2[%c0_20, %c0_21, %c0_22, %c0_23] : memref<1x9x9x4xbf16, #tpu.memory_space<vmem>>, vector<1x8x8x4xbf16>
    %15 = vector.shape_cast %14 : vector<1x8x8x4xbf16> to vector<8x8x4xbf16>
    %16 = vector.shape_cast %15 : vector<8x8x4xbf16> to vector<64x4xbf16>
    %c1 = arith.constant 1 : index
    %c0_24 = arith.constant 0 : index
    %c0_25 = arith.constant 0 : index
    %17 = vector.load %arg5[%c1, %c0_24, %c0_25] : memref<9x4x128xbf16, #tpu.memory_space<vmem>>, vector<1x4x128xbf16>
    %18 = vector.shape_cast %17 : vector<1x4x128xbf16> to vector<4x128xbf16>
    %cst_26 = arith.constant dense<0.000000e+00> : vector<64x128xf32>
    %19 = tpu.matmul %16, %18, %cst_26 {dimension_numbers = #tpu.dot_dimension_numbers<[1], [0], [0], [1], [0, 0, 1, 1], [], []>} : vector<64x4xbf16>, vector<4x128xbf16>, vector<64x128xf32> -> vector<64x128xf32>
    %20 = arith.addf %13, %19 : vector<64x128xf32>
    %c0_27 = arith.constant 0 : index
    %c0_28 = arith.constant 0 : index
    %c1_29 = arith.constant 1 : index
    %c0_30 = arith.constant 0 : index
    %21 = vector.load %arg1[%c0_27, %c0_28, %c1_29, %c0_30] : memref<1x9x9x4xbf16, #tpu.memory_space<vmem>>, vector<1x8x8x4xbf16>
    %22 = vector.shape_cast %21 : vector<1x8x8x4xbf16> to vector<8x8x4xbf16>
    %23 = vector.shape_cast %22 : vector<8x8x4xbf16> to vector<64x4xbf16>
    %c2 = arith.constant 2 : index
    %c0_31 = arith.constant 0 : index
    %c0_32 = arith.constant 0 : index
    %24 = vector.load %arg5[%c2, %c0_31, %c0_32] : memref<9x4x128xbf16, #tpu.memory_space<vmem>>, vector<1x4x128xbf16>
    %25 = vector.shape_cast %24 : vector<1x4x128xbf16> to vector<4x128xbf16>
    %cst_33 = arith.constant dense<0.000000e+00> : vector<64x128xf32>
    %26 = tpu.matmul %23, %25, %cst_33 {dimension_numbers = #tpu.dot_dimension_numbers<[1], [0], [0], [1], [0, 0, 1, 1], [], []>} : vector<64x4xbf16>, vector<4x128xbf16>, vector<64x128xf32> -> vector<64x128xf32>
    %27 = arith.addf %20, %26 : vector<64x128xf32>
    %c0_34 = arith.constant 0 : index
    %c0_35 = arith.constant 0 : index
    %c0_36 = arith.constant 0 : index
    %c0_37 = arith.constant 0 : index
    %28 = vector.load %arg3[%c0_34, %c0_35, %c0_36, %c0_37] : memref<1x9x9x4xbf16, #tpu.memory_space<vmem>>, vector<1x8x8x4xbf16>
    %29 = vector.shape_cast %28 : vector<1x8x8x4xbf16> to vector<8x8x4xbf16>
    %30 = vector.shape_cast %29 : vector<8x8x4xbf16> to vector<64x4xbf16>
    %c3 = arith.constant 3 : index
    %c0_38 = arith.constant 0 : index
    %c0_39 = arith.constant 0 : index
    %31 = vector.load %arg5[%c3, %c0_38, %c0_39] : memref<9x4x128xbf16, #tpu.memory_space<vmem>>, vector<1x4x128xbf16>
    %32 = vector.shape_cast %31 : vector<1x4x128xbf16> to vector<4x128xbf16>
    %cst_40 = arith.constant dense<0.000000e+00> : vector<64x128xf32>
    %33 = tpu.matmul %30, %32, %cst_40 {dimension_numbers = #tpu.dot_dimension_numbers<[1], [0], [0], [1], [0, 0, 1, 1], [], []>} : vector<64x4xbf16>, vector<4x128xbf16>, vector<64x128xf32> -> vector<64x128xf32>
    %34 = arith.addf %27, %33 : vector<64x128xf32>
    %c0_41 = arith.constant 0 : index
    %c0_42 = arith.constant 0 : index
    %c0_43 = arith.constant 0 : index
    %c0_44 = arith.constant 0 : index
    %35 = vector.load %arg4[%c0_41, %c0_42, %c0_43, %c0_44] : memref<1x9x9x4xbf16, #tpu.memory_space<vmem>>, vector<1x8x8x4xbf16>
    %36 = vector.shape_cast %35 : vector<1x8x8x4xbf16> to vector<8x8x4xbf16>
    %37 = vector.shape_cast %36 : vector<8x8x4xbf16> to vector<64x4xbf16>
    %c4 = arith.constant 4 : index
    %c0_45 = arith.constant 0 : index
    %c0_46 = arith.constant 0 : index
    %38 = vector.load %arg5[%c4, %c0_45, %c0_46] : memref<9x4x128xbf16, #tpu.memory_space<vmem>>, vector<1x4x128xbf16>
    %39 = vector.shape_cast %38 : vector<1x4x128xbf16> to vector<4x128xbf16>
    %cst_47 = arith.constant dense<0.000000e+00> : vector<64x128xf32>
    %40 = tpu.matmul %37, %39, %cst_47 {dimension_numbers = #tpu.dot_dimension_numbers<[1], [0], [0], [1], [0, 0, 1, 1], [], []>} : vector<64x4xbf16>, vector<4x128xbf16>, vector<64x128xf32> -> vector<64x128xf32>
    %41 = arith.addf %34, %40 : vector<64x128xf32>
    %c0_48 = arith.constant 0 : index
    %c0_49 = arith.constant 0 : index
    %c1_50 = arith.constant 1 : index
    %c0_51 = arith.constant 0 : index
    %42 = vector.load %arg3[%c0_48, %c0_49, %c1_50, %c0_51] : memref<1x9x9x4xbf16, #tpu.memory_space<vmem>>, vector<1x8x8x4xbf16>
    %43 = vector.shape_cast %42 : vector<1x8x8x4xbf16> to vector<8x8x4xbf16>
    %44 = vector.shape_cast %43 : vector<8x8x4xbf16> to vector<64x4xbf16>
    %c5 = arith.constant 5 : index
    %c0_52 = arith.constant 0 : index
    %c0_53 = arith.constant 0 : index
    %45 = vector.load %arg5[%c5, %c0_52, %c0_53] : memref<9x4x128xbf16, #tpu.memory_space<vmem>>, vector<1x4x128xbf16>
    %46 = vector.shape_cast %45 : vector<1x4x128xbf16> to vector<4x128xbf16>
    %cst_54 = arith.constant dense<0.000000e+00> : vector<64x128xf32>
    %47 = tpu.matmul %44, %46, %cst_54 {dimension_numbers = #tpu.dot_dimension_numbers<[1], [0], [0], [1], [0, 0, 1, 1], [], []>} : vector<64x4xbf16>, vector<4x128xbf16>, vector<64x128xf32> -> vector<64x128xf32>
    %48 = arith.addf %41, %47 : vector<64x128xf32>
    %c0_55 = arith.constant 0 : index
    %c1_56 = arith.constant 1 : index
    %c0_57 = arith.constant 0 : index
    %c0_58 = arith.constant 0 : index
    %49 = vector.load %arg1[%c0_55, %c1_56, %c0_57, %c0_58] : memref<1x9x9x4xbf16, #tpu.memory_space<vmem>>, vector<1x8x8x4xbf16>
    %50 = vector.shape_cast %49 : vector<1x8x8x4xbf16> to vector<8x8x4xbf16>
    %51 = vector.shape_cast %50 : vector<8x8x4xbf16> to vector<64x4xbf16>
    %c6 = arith.constant 6 : index
    %c0_59 = arith.constant 0 : index
    %c0_60 = arith.constant 0 : index
    %52 = vector.load %arg5[%c6, %c0_59, %c0_60] : memref<9x4x128xbf16, #tpu.memory_space<vmem>>, vector<1x4x128xbf16>
    %53 = vector.shape_cast %52 : vector<1x4x128xbf16> to vector<4x128xbf16>
    %cst_61 = arith.constant dense<0.000000e+00> : vector<64x128xf32>
    %54 = tpu.matmul %51, %53, %cst_61 {dimension_numbers = #tpu.dot_dimension_numbers<[1], [0], [0], [1], [0, 0, 1, 1], [], []>} : vector<64x4xbf16>, vector<4x128xbf16>, vector<64x128xf32> -> vector<64x128xf32>
    %55 = arith.addf %48, %54 : vector<64x128xf32>
    %c0_62 = arith.constant 0 : index
    %c1_63 = arith.constant 1 : index
    %c0_64 = arith.constant 0 : index
    %c0_65 = arith.constant 0 : index
    %56 = vector.load %arg2[%c0_62, %c1_63, %c0_64, %c0_65] : memref<1x9x9x4xbf16, #tpu.memory_space<vmem>>, vector<1x8x8x4xbf16>
    %57 = vector.shape_cast %56 : vector<1x8x8x4xbf16> to vector<8x8x4xbf16>
    %58 = vector.shape_cast %57 : vector<8x8x4xbf16> to vector<64x4xbf16>
    %c7 = arith.constant 7 : index
    %c0_66 = arith.constant 0 : index
    %c0_67 = arith.constant 0 : index
    %59 = vector.load %arg5[%c7, %c0_66, %c0_67] : memref<9x4x128xbf16, #tpu.memory_space<vmem>>, vector<1x4x128xbf16>
    %60 = vector.shape_cast %59 : vector<1x4x128xbf16> to vector<4x128xbf16>
    %cst_68 = arith.constant dense<0.000000e+00> : vector<64x128xf32>
    %61 = tpu.matmul %58, %60, %cst_68 {dimension_numbers = #tpu.dot_dimension_numbers<[1], [0], [0], [1], [0, 0, 1, 1], [], []>} : vector<64x4xbf16>, vector<4x128xbf16>, vector<64x128xf32> -> vector<64x128xf32>
    %62 = arith.addf %55, %61 : vector<64x128xf32>
    %c0_69 = arith.constant 0 : index
    %c1_70 = arith.constant 1 : index
    %c1_71 = arith.constant 1 : index
    %c0_72 = arith.constant 0 : index
    %63 = vector.load %arg1[%c0_69, %c1_70, %c1_71, %c0_72] : memref<1x9x9x4xbf16, #tpu.memory_space<vmem>>, vector<1x8x8x4xbf16>
    %64 = vector.shape_cast %63 : vector<1x8x8x4xbf16> to vector<8x8x4xbf16>
    %65 = vector.shape_cast %64 : vector<8x8x4xbf16> to vector<64x4xbf16>
    %c8 = arith.constant 8 : index
    %c0_73 = arith.constant 0 : index
    %c0_74 = arith.constant 0 : index
    %66 = vector.load %arg5[%c8, %c0_73, %c0_74] : memref<9x4x128xbf16, #tpu.memory_space<vmem>>, vector<1x4x128xbf16>
    %67 = vector.shape_cast %66 : vector<1x4x128xbf16> to vector<4x128xbf16>
    %cst_75 = arith.constant dense<0.000000e+00> : vector<64x128xf32>
    %68 = tpu.matmul %65, %67, %cst_75 {dimension_numbers = #tpu.dot_dimension_numbers<[1], [0], [0], [1], [0, 0, 1, 1], [], []>} : vector<64x4xbf16>, vector<4x128xbf16>, vector<64x128xf32> -> vector<64x128xf32>
    %69 = arith.addf %62, %68 : vector<64x128xf32>
    %c0_76 = arith.constant 0 : index
    %c0_77 = arith.constant 0 : index
    %70 = vector.load %arg6[%c0_76, %c0_77] : memref<1x128xf32, #tpu.memory_space<vmem>>, vector<1x128xf32>
    %71 = vector.broadcast %70 : vector<1x128xf32> to vector<64x128xf32>
    %72 = arith.addf %69, %71 : vector<64x128xf32>
    %cst_78 = arith.constant 0.000000e+00 : f32
    %73 = vector.broadcast %cst_78 : f32 to vector<64x128xf32>
    %74 = arith.maximumf %72, %73 : vector<64x128xf32>
    %75 = vector.shape_cast %74 : vector<64x128xf32> to vector<8x8x128xf32>
    %76 = arith.truncf %75 : vector<8x8x128xf32> to vector<8x8x128xbf16>
    %c1_79 = arith.constant 1 : index
    %c1_80 = arith.constant 1 : index
    %c0_81 = arith.constant 0 : index
    %77 = vector.load %arg11[%c1_79, %c1_80, %c0_81] : memref<10x10x128xbf16, #tpu.memory_space<vmem>>, vector<8x8x128xbf16>
    tpu.vector_store %arg11[%c1_79, %c1_80, %c0_81], %76 {strides = array<i32>} : memref<10x10x128xbf16, #tpu.memory_space<vmem>>, vector<8x8x128xbf16>,
    %c0_82 = arith.constant 0 : index
    %c0_83 = arith.constant 0 : index
    %c0_84 = arith.constant 0 : index
    %78 = vector.load %arg11[%c0_82, %c0_83, %c0_84] : memref<10x10x128xbf16, #tpu.memory_space<vmem>>, vector<8x8x128xbf16>
    %79 = vector.shape_cast %78 : vector<8x8x128xbf16> to vector<64x128xbf16>
    %c0_85 = arith.constant 0 : index
    %c1_86 = arith.constant 1 : index
    %c0_87 = arith.constant 0 : index
    %80 = vector.load %arg11[%c0_85, %c1_86, %c0_87] : memref<10x10x128xbf16, #tpu.memory_space<vmem>>, vector<8x8x128xbf16>
    %81 = vector.shape_cast %80 : vector<8x8x128xbf16> to vector<64x128xbf16>
    %c0_88 = arith.constant 0 : index
    %c2_89 = arith.constant 2 : index
    %c0_90 = arith.constant 0 : index
    %82 = vector.load %arg11[%c0_88, %c2_89, %c0_90] : memref<10x10x128xbf16, #tpu.memory_space<vmem>>, vector<8x8x128xbf16>
    %83 = vector.shape_cast %82 : vector<8x8x128xbf16> to vector<64x128xbf16>
    %c1_91 = arith.constant 1 : index
    %c0_92 = arith.constant 0 : index
    %c0_93 = arith.constant 0 : index
    %84 = vector.load %arg11[%c1_91, %c0_92, %c0_93] : memref<10x10x128xbf16, #tpu.memory_space<vmem>>, vector<8x8x128xbf16>
    %85 = vector.shape_cast %84 : vector<8x8x128xbf16> to vector<64x128xbf16>
    %c1_94 = arith.constant 1 : index
    %c1_95 = arith.constant 1 : index
    %c0_96 = arith.constant 0 : index
    %86 = vector.load %arg11[%c1_94, %c1_95, %c0_96] : memref<10x10x128xbf16, #tpu.memory_space<vmem>>, vector<8x8x128xbf16>
    %87 = vector.shape_cast %86 : vector<8x8x128xbf16> to vector<64x128xbf16>
    %c1_97 = arith.constant 1 : index
    %c2_98 = arith.constant 2 : index
    %c0_99 = arith.constant 0 : index
    %88 = vector.load %arg11[%c1_97, %c2_98, %c0_99] : memref<10x10x128xbf16, #tpu.memory_space<vmem>>, vector<8x8x128xbf16>
    %89 = vector.shape_cast %88 : vector<8x8x128xbf16> to vector<64x128xbf16>
    %c2_100 = arith.constant 2 : index
    %c0_101 = arith.constant 0 : index
    %c0_102 = arith.constant 0 : index
    %90 = vector.load %arg11[%c2_100, %c0_101, %c0_102] : memref<10x10x128xbf16, #tpu.memory_space<vmem>>, vector<8x8x128xbf16>
    %91 = vector.shape_cast %90 : vector<8x8x128xbf16> to vector<64x128xbf16>
    %c2_103 = arith.constant 2 : index
    %c1_104 = arith.constant 1 : index
    %c0_105 = arith.constant 0 : index
    %92 = vector.load %arg11[%c2_103, %c1_104, %c0_105] : memref<10x10x128xbf16, #tpu.memory_space<vmem>>, vector<8x8x128xbf16>
    %93 = vector.shape_cast %92 : vector<8x8x128xbf16> to vector<64x128xbf16>
    %c2_106 = arith.constant 2 : index
    %c2_107 = arith.constant 2 : index
    %c0_108 = arith.constant 0 : index
    %94 = vector.load %arg11[%c2_106, %c2_107, %c0_108] : memref<10x10x128xbf16, #tpu.memory_space<vmem>>, vector<8x8x128xbf16>
    %95 = vector.shape_cast %94 : vector<8x8x128xbf16> to vector<64x128xbf16>
    %96 = tpu.concatenate %79, %81, %83, %85, %87, %89, %91, %93, %95 in 1 : vector<64x128xbf16>, vector<64x128xbf16>, vector<64x128xbf16>, vector<64x128xbf16>, vector<64x128xbf16>, vector<64x128xbf16>, vector<64x128xbf16>, vector<64x128xbf16>, vector<64x128xbf16> -> vector<64x1152xbf16>
    %c0_109 = arith.constant 0 : index
    %c0_110 = arith.constant 0 : index
    %97 = vector.load %arg7[%c0_109, %c0_110] : memref<1152x128xbf16, #tpu.memory_space<vmem>>, vector<1152x128xbf16>
    %cst_111 = arith.constant dense<0.000000e+00> : vector<64x128xf32>
    %98 = tpu.matmul %96, %97, %cst_111 {dimension_numbers = #tpu.dot_dimension_numbers<[1], [0], [0], [1], [0, 0, 1, 1], [], []>} : vector<64x1152xbf16>, vector<1152x128xbf16>, vector<64x128xf32> -> vector<64x128xf32>
    %c0_112 = arith.constant 0 : index
    %c0_113 = arith.constant 0 : index
    %c0_114 = arith.constant 0 : index
    %c0_115 = arith.constant 0 : index
    %99 = vector.load %arg4[%c0_112, %c0_113, %c0_114, %c0_115] : memref<1x9x9x4xbf16, #tpu.memory_space<vmem>>, vector<1x8x8x4xbf16>
    %100 = vector.shape_cast %99 : vector<1x8x8x4xbf16> to vector<8x8x4xbf16>
    %101 = vector.shape_cast %100 : vector<8x8x4xbf16> to vector<64x4xbf16>
    %c0_116 = arith.constant 0 : index
    %c0_117 = arith.constant 0 : index
    %102 = vector.load %arg9[%c0_116, %c0_117] : memref<4x128xbf16, #tpu.memory_space<vmem>>, vector<4x128xbf16>
    %cst_118 = arith.constant dense<0.000000e+00> : vector<64x128xf32>
    %103 = tpu.matmul %101, %102, %cst_118 {dimension_numbers = #tpu.dot_dimension_numbers<[1], [0], [0], [1], [0, 0, 1, 1], [], []>} : vector<64x4xbf16>, vector<4x128xbf16>, vector<64x128xf32> -> vector<64x128xf32>
    %104 = arith.addf %98, %103 : vector<64x128xf32>
    %c0_119 = arith.constant 0 : index
    %c0_120 = arith.constant 0 : index
    %105 = vector.load %arg8[%c0_119, %c0_120] : memref<1x128xf32, #tpu.memory_space<vmem>>, vector<1x128xf32>
    %106 = vector.broadcast %105 : vector<1x128xf32> to vector<64x128xf32>
    %107 = arith.addf %104, %106 : vector<64x128xf32>
    %c0_121 = arith.constant 0 : index
    %c0_122 = arith.constant 0 : index
    %c0_123 = arith.constant 0 : index
    %108 = vector.load %arg10[%c0_121, %c0_122, %c0_123] : memref<1x64x128xf32, #tpu.memory_space<vmem>>, vector<1x64x128xf32>
    %109 = vector.shape_cast %108 : vector<1x64x128xf32> to vector<64x128xf32>
    %110 = vector.shape_cast %107 : vector<64x128xf32> to vector<1x64x128xf32>
    tpu.vector_store %arg10[%c0_121, %c0_122, %c0_123], %110 {strides = array<i32>} : memref<1x64x128xf32, #tpu.memory_space<vmem>>, vector<1x64x128xf32>,
    return
  }
  func.func @transform_0(%arg0: i32) -> (i32, i32, i32, i32) {
    %c0_i32 = arith.constant 0 : i32
    %c0_i32_0 = arith.constant 0 : i32
    %c0_i32_1 = arith.constant 0 : i32
    %c0_i32_2 = arith.constant 0 : i32
    return %arg0, %c0_i32, %c0_i32_0, %c0_i32_1 : i32, i32, i32, i32
  }
  func.func @transform_1(%arg0: i32) -> (i32, i32, i32, i32) {
    %c0_i32 = arith.constant 0 : i32
    %c0_i32_0 = arith.constant 0 : i32
    %c0_i32_1 = arith.constant 0 : i32
    %c0_i32_2 = arith.constant 0 : i32
    return %arg0, %c0_i32, %c0_i32_0, %c0_i32_1 : i32, i32, i32, i32
  }
  func.func @transform_2(%arg0: i32) -> (i32, i32, i32, i32) {
    %c0_i32 = arith.constant 0 : i32
    %c0_i32_0 = arith.constant 0 : i32
    %c0_i32_1 = arith.constant 0 : i32
    %c0_i32_2 = arith.constant 0 : i32
    return %arg0, %c0_i32, %c0_i32_0, %c0_i32_1 : i32, i32, i32, i32
  }
  func.func @transform_3(%arg0: i32) -> (i32, i32, i32, i32) {
    %c0_i32 = arith.constant 0 : i32
    %c0_i32_0 = arith.constant 0 : i32
    %c0_i32_1 = arith.constant 0 : i32
    %c0_i32_2 = arith.constant 0 : i32
    return %arg0, %c0_i32, %c0_i32_0, %c0_i32_1 : i32, i32, i32, i32
  }
  func.func @transform_4(%arg0: i32) -> (i32, i32, i32) {
    %c0_i32 = arith.constant 0 : i32
    %c0_i32_0 = arith.constant 0 : i32
    %c0_i32_1 = arith.constant 0 : i32
    %c0_i32_2 = arith.constant 0 : i32
    return %c0_i32, %c0_i32_0, %c0_i32_1 : i32, i32, i32
  }
  func.func @transform_5(%arg0: i32) -> (i32, i32) {
    %c0_i32 = arith.constant 0 : i32
    %c0_i32_0 = arith.constant 0 : i32
    %c0_i32_1 = arith.constant 0 : i32
    return %c0_i32, %c0_i32_0 : i32, i32
  }
  func.func @transform_6(%arg0: i32) -> (i32, i32) {
    %c0_i32 = arith.constant 0 : i32
    %c0_i32_0 = arith.constant 0 : i32
    %c0_i32_1 = arith.constant 0 : i32
    return %c0_i32, %c0_i32_0 : i32, i32
  }
  func.func @transform_7(%arg0: i32) -> (i32, i32) {
    %c0_i32 = arith.constant 0 : i32
    %c0_i32_0 = arith.constant 0 : i32
    %c0_i32_1 = arith.constant 0 : i32
    return %c0_i32, %c0_i32_0 : i32, i32
  }
  func.func @transform_8(%arg0: i32) -> (i32, i32) {
    %c0_i32 = arith.constant 0 : i32
    %c0_i32_0 = arith.constant 0 : i32
    %c0_i32_1 = arith.constant 0 : i32
    return %c0_i32, %c0_i32_0 : i32, i32
  }
  func.func @transform_9(%arg0: i32) -> (i32, i32, i32) {
    %c0_i32 = arith.constant 0 : i32
    %c0_i32_0 = arith.constant 0 : i32
    %c0_i32_1 = arith.constant 0 : i32
    return %arg0, %c0_i32, %c0_i32_0 : i32, i32, i32
  }
}

</mosaic_0001>

<bundles_post_ra>
// kernel: resblk_forward.1
= control target key start
LH: loop header
LB: loop body
LE: loop exit
PB: predicated region body
PF: predicated region fallthrough
CT: control target
= control target key end

     0   :  { %s4712_s30 = smov 0   ;;  %s5802_s0 = inlined_call_operand.vmem [shape: bf16[2,9,9,4], index: 0, kind: input, shape index: {}]   ;;  %s5803_s1 = inlined_call_operand.vmem [shape: bf16[2,9,9,4], index: 1, kind: input, shape index: {}]   ;;  %s5804_s2 = inlined_call_operand.vmem [shape: bf16[2,9,9,4], index: 2, kind: input, shape index: {}]   ;;  %s5805_s3 = inlined_call_operand.vmem [shape: bf16[2,9,9,4], index: 3, kind: input, shape index: {}]   ;;  %s5806_s4 = inlined_call_operand.vmem [shape: bf16[9,4,128], index: 4, kind: input, shape index: {}]   ;;  %s5807_s5 = inlined_call_operand.vmem [shape: f32[1,128], index: 5, kind: input, shape index: {}]   ;;  %s5808_s6 = inlined_call_operand.vmem [shape: bf16[1152,128], index: 6, kind: input, shape index: {}]   ;;  %s5809_s7 = inlined_call_operand.vmem [shape: f32[1,128], index: 7, kind: input, shape index: {}]   ;;  %s5810_s8 = inlined_call_operand.vmem [shape: bf16[4,128], index: 8, kind: input, shape index: {}]   ;;  %s5811_s9 = inlined_call_operand.vmem [shape: f32[2,64,128], index: 9, kind: output, shape index: {}]  }
   0x1 LB: > { %s3886_s10 = sadd.s32 4294967295, %s4659_s30   ;;  %p3890_p0 = scmp.ge.s32.totalorder %s4659_s30, 1  ;;  %s4659_s30 = sphi %s4712_s30, %s19_s30  }
   0x2   : > { %p317_p1 = scmp.lt.s32.totalorder %s4659_s30, 3 }
   0x4   : > { %p318_p2 = pnand %p3890_p0, %p317_p1 }
   0x6   : > { %321 = sbr.rel (%p318_p2) target bundleno = 606 (0x25e), region = 56 }
   0xb   : > { %v3897_v0 = vld [vmem:[%s5806_s4 + $0x2] sm:$0x3]  ;;  %vm516_vm0 = vcmask 1041408   ;;  %p368_p3 = scmp.lt.s32.totalorder %s3886_s10, 1  ;;  %v472_v2 = vld [vmem:[%s5806_s4] sm:$0x3] }
   0xc   : > { %4519 = vmatprep.subr.msk.bf16.mxu1 %vm516_vm0, %v3897_v0  ;;  %4518 = vmatprep.subr.msk.bf16.mxu0 %vm516_vm0, %v3897_v0  ;;  %v518_v1 = vsel %vm516_vm0, %v3897_v0, 0  ;;  %v3914_v3 = vld [vmem:[%s5806_s4 + $0x4] sm:$0x3]  ;;  %vm503_vm1 = vcmask 31744   ;;  %v618_v4 = vsel %vm516_vm0, %v472_v2, 0  ;;  %vm399_vm5 = vcmask 1040384  }
   0xd   : > { %4517 = vmatpush3.bf16.msra.mxu1 %v518_v1  ;;  %4393 = vmatpush3.bf16.msra.mxu0 %v518_v1  ;;  %s5843_s10 = smov (!%p368_p3, %s3886_s10), 1  ;;  %v843_v5 = vsel %vm516_vm0, %v3914_v3, 0  ;;  %v3923_v7 = vld [vmem:[%s5806_s4 + $0x6] sm:$0x3]  ;;  %v3932_v8 = vld [vmem:[%s5806_s4 + $0x8] sm:$0x3] }
   0xe   : > { %4520 = vmatprep.subr.msk.bf16.mxu1 %vm516_vm0, %v472_v2  ;;  %4521 = vmatprep.subr.msk.bf16.mxu0 %vm516_vm0, %v3914_v3  ;;  %s4737_s17 = smul.u32 72, %s5843_s10  ;;  %vm701_vm2 = vsmask.f32 3328  ;;  %vm702_vm3 = vsmask.f32 7440  ;;  %v961_v13 = vsel %vm516_vm0, %v3923_v7, 0 }
   0xf   : > { %v4770_v14 = vsel %vm516_vm0, %v3932_v8, 0  ;;  %v4787_v38 = vld [vmem:[%s5806_s4 + $0xa] sm:$0x3]  ;;  %vm4791_vm4 = vmor %vm701_vm2, %vm702_vm3  ;;  %vm400_vm6 = vsmask.f32 256  ;;  %vm2190_vm10 = vcmask 1042432  }
  0x10   : > { %s4743_s20 = scalar_lea.vmem %s5803_s1, %s4737_s17  ;;  %s4761_s27 = scalar_lea.vmem %s5802_s0, %s4737_s17  ;;  %vm4973_vm7 = vmand %vm399_vm5, %vm400_vm6  ;;  %vm432_vm8 = vsmask.f32 7938  ;;  %vm2191_vm11 = vcmask 1046532   ;;  %vm1988_vm12 = vcmask 1043456  }
  0x11   : > { %v4539_v6 = vld [vmem:[%s4743_s20] ss:$8 sps:$4 sm:$0xff]   ;;  %v4541_v10 = vld [vmem:[%s4743_s20 + $0x10] ss:$8 sps:$4 sm:$0xff]   ;;  %v686_v16 = vld [vmem:[%s4761_s27 + $0x4] sm:$0x1]  ;;  %s4824_s15 = scalar_lea.vmem %s5804_s2, %s4737_s17  ;;  %s4840_s19 = scalar_lea.vmem %s5805_s3, %s4737_s17 }
  0x12   : > { %v4540_v9 = vld [vmem:[%s4743_s20 + $0x20] ss:$8 sps:$4 sm:$0xff]   ;;  %4394 = vmatprep.mubr.msk.bf16.mxu0 %vm503_vm1, %v4539_v6  ;;  %v4542_v11 = vld [vmem:[%s4743_s20 + $0x30] ss:$8 sps:$4 sm:$0xff]   ;;  %v688_v19 = vld [vmem:[%s4761_s27 + $0xc] sm:$0x1] }
  0x13   : > { %4398 = vmatprep.mubr.msk.bf16.mxu1 %vm503_vm1, %v4540_v9  ;;  %4395 = vmatmul.mubr.msk.bf16.vlgmr.msra.gmra.mxu0 %vm503_vm1, %v4541_v10  ;;  %v4543_v12 = vld [vmem:[%s4761_s27] ss:$8 sps:$4 sm:$0xff]   ;;  %v4544_v18 = vld [vmem:[%s4761_s27 + $0x10] ss:$8 sps:$4 sm:$0xff]   ;;  %v714_v22 = vshll.u32 %v686_v16, 16  ;;  %v728_v25 = vshll.u32 %v688_v19, 16  ;;  %vm4980_vm9 = vmand %vm399_vm5, %vm432_vm8 }
  0x14   : > { %4399 = vmatmul.mubr.msk.bf16.vlgmr.msra.gmra.mxu1 %vm503_vm1, %v4542_v11  ;;  %4413 = vmatpush3.bf16.msra.mxu0 %v843_v5  ;;  %v685_v15 = vld [vmem:[%s4761_s27] sm:$0xf]  ;;  %v687_v17 = vld [vmem:[%s4761_s27 + $0x8] sm:$0xf]  ;;  %v689_v26 = vld [vmem:[%s4761_s27 + $0x10] sm:$0xf] }
  0x15   : > { %4403 = vmatpush3.bf16.msra.mxu1 %v618_v4  ;;  %4404 = vmatprep.mubr.msk.bf16.mxu1 %vm503_vm1, %v4543_v12  ;;  %v705_v20 = vshrl.u32 %v685_v15, 16  ;;  %v708_v21 = vshll.u32 %v685_v15, 16  ;;  %v719_v23 = vshrl.u32 %v687_v17, 16  ;;  %v722_v24 = vshll.u32 %v687_v17, 16  ;;  %v690_v27 = vld [vmem:[%s4761_s27 + $0x14] sm:$0x1]  ;;  %vm5200_vm13 = vmor %vm2190_vm10, %vm2191_vm11 }
  0x16   : > { %4522 = vmatprep.subr.msk.bf16.mxu1 %vm516_vm0, %v3923_v7  ;;  %4523 = vmatprep.subr.msk.bf16.mxu0 %vm516_vm0, %v3932_v8  ;;  %v716_v30 = vrot.slane %v714_v22, 5  ;;  %v691_v32 = vld [vmem:[%s4761_s27 + $0x18] sm:$0xf]  ;;  %v730_v34 = vrot.slane %v728_v25, 5  ;;  %v692_v35 = vld [vmem:[%s4761_s27 + $0x1c] sm:$0x1]  ;;  %vm5229_vm14 = vmand %vm1988_vm12, %vm432_vm8 }
  0x17   : > { %v707_v28 = vrot.slane %v705_v20, 4  ;;  %v710_v29 = vrot.slane %v708_v21, 5  ;;  %v721_v31 = vrot.slane %v719_v23, 4  ;;  %v724_v33 = vrot.slane %v722_v24, 5  ;;  %v4545_v52 = vld [vmem:[%s4761_s27 + $0x20] ss:$8 sps:$4 sm:$0xff]  }
  0x18   : > { %v733_v36 = vshrl.u32 %v689_v26, 16  ;;  %v736_v37 = vshll.u32 %v689_v26, 16  ;;  %v742_v40 = vshll.u32 %v690_v27, 16  ;;  %v747_v41 = vshrl.u32 %v691_v32, 16  ;;  %v4546_v58 = vld [vmem:[%s4761_s27 + $0x30] ss:$8 sps:$4 sm:$0xff]  }
  0x19   : > { %v711_v39 = vor.u32 %v710_v29, %v707_v28  ;;  %v750_v42 = vshll.u32 %v691_v32, 16  ;;  %v725_v44 = vor.u32 %v724_v33, %v721_v31  ;;  %v756_v47 = vshll.u32 %v692_v35, 16  ;;  %v693_v59 = vld [vmem:[%s4761_s27 + $0x20] sm:$0xf]  ;;  %v694_v60 = vld [vmem:[%s4761_s27 + $0x24] sm:$0x1] }
  0x1a   : > { %v735_v45 = vrot.slane %v733_v36, 4  ;;  %v738_v46 = vrot.slane %v736_v37, 5  ;;  %v744_v49 = vrot.slane %v742_v40, 5  ;;  %v749_v50 = vrot.slane %v747_v41, 4  ;;  %v695_v63 = vld [vmem:[%s4761_s27 + $0x28] sm:$0xf] }
  0x1b   : > { %v712_v48 = vrot.slane %v711_v39, 4  ;;  %v752_v51 = vrot.slane %v750_v42, 5  ;;  %v726_v53 = vrot.slane %v725_v44, 4  ;;  %v758_v55 = vrot.slane %v756_v47, 5  ;;  %v696_v0 = vld [vmem:[%s4761_s27 + $0x2c] sm:$0x1] }
  0x1c   : > { %4405 = vmatmul.mubr.msk.bf16.vlgmr.msra.gmra.mxu1 %vm503_vm1, %v4544_v18  ;;  %v739_v54 = vor.u32 %v738_v46, %v735_v45  ;;  %v761_v1 = vshrl.u32 %v693_v59, 16  ;;  %v764_v4 = vshll.u32 %v693_v59, 16  ;;  %v770_v5 = vshll.u32 %v694_v60, 16  ;;  %v697_v6 = vld [vmem:[%s4761_s27 + $0x30] sm:$0xf] }
  0x1d   : > { %4423 = vmatpush3.bf16.msra.mxu1 %v961_v13  ;;  %v717_v56 = vsel %vm4791_vm4, %v712_v48, %v716_v30  ;;  %v753_v57 = vor.u32 %v752_v51, %v749_v50  ;;  %4408 = vmatprep.mubr.msk.bf16.mxu1 %vm503_vm1, %v4545_v52  ;;  %v731_v61 = vsel %vm4791_vm4, %v726_v53, %v730_v34  ;;  %v775_v9 = vshrl.u32 %v695_v63, 16  ;;  %v698_v11 = vld [vmem:[%s4761_s27 + $0x34] sm:$0x1]  ;;  %v699_v17 = vld [vmem:[%s4761_s27 + $0x38] sm:$0xf] }
  0x1e   : > { %4524 = vmatprep.subr.msk.bf16.mxu1 %vm516_vm0, %v4787_v38  ;;  %v740_v62 = vrot.slane %v739_v54, 4  ;;  %v3915_v2 = vcombine.low %v717_v56, %v731_v61  ;;  %v763_v8 = vrot.slane %v761_v1, 4  ;;  %v778_v10 = vshll.u32 %v695_v63, 16  ;;  %v3958_v18 = vld [vmem:[%s5806_s4 + $0xc] sm:$0x3] }
  0x1f   : > { %v754_v3 = vrot.slane %v753_v57, 4  ;;  %v766_v13 = vrot.slane %v764_v4, 5  ;;  %v772_v15 = vrot.slane %v770_v5, 5  ;;  %v784_v16 = vshll.u32 %v696_v0, 16  ;;  %v700_v22 = vld [vmem:[%s4761_s27 + $0x3c] sm:$0x1] }
  0x20   : > { %v745_v7 = vsel %vm4791_vm4, %v740_v62, %v744_v49  ;;  %4414 = vmatprep.mubr.msk.bf16.mxu0 %vm503_vm1, %v3915_v2  ;;  %v777_v20 = vrot.slane %v775_v9, 4  ;;  %v780_v21 = vrot.slane %v778_v10, 5  ;;  %v789_v23 = vshrl.u32 %v697_v6, 16  ;;  %v4547_v35 = vld [vmem:[%s4824_s15] ss:$8 sps:$4 sm:$0xff]  }
  0x21   : > { %v759_v12 = vsel %vm4791_vm4, %v754_v3, %v758_v55  ;;  %v767_v24 = vor.u32 %v766_v13, %v763_v8  ;;  %v786_v25 = vrot.slane %v784_v16, 5  ;;  %v792_v26 = vshll.u32 %v697_v6, 16  ;;  %v4548_v44 = vld [vmem:[%s4824_s15 + $0x10] ss:$8 sps:$4 sm:$0xff]   ;;  %v3975_v51 = vld [vmem:[%s5806_s4 + $0xe] sm:$0x3] }
  0x22   : > { %v3916_v19 = vcombine.low %v745_v7, %v759_v12  ;;  %v798_v27 = vshll.u32 %v698_v11, 16  ;;  %v781_v28 = vor.u32 %v780_v21, %v777_v20  ;;  %v791_v29 = vrot.slane %v789_v23, 4  ;;  %v4551_v53 = vld [vmem:[%s4824_s15 + $0x20] ss:$8 sps:$4 sm:$0xff]   ;;  %v4552_v57 = vld [vmem:[%s4824_s15 + $0x30] ss:$8 sps:$4 sm:$0xff]  }
  0x23   : > { %v803_v30 = vshrl.u32 %v699_v17, 16  ;;  %v806_v31 = vshll.u32 %v699_v17, 16  ;;  %v768_v32 = vrot.slane %v767_v24, 4  ;;  %v794_v33 = vrot.slane %v792_v26, 5  ;;  %v1155_v59 = vld [vmem:[%s4824_s15 + $0x4] sm:$0x1] }
  0x24   : > { %4409 = vmatmul.mubr.msk.bf16.gmra.mxu1 %vm503_vm1, %v4546_v58  ;;  %4415 = vmatmul.mubr.msk.bf16.vlgmr.msra.gmra.mxu0 %vm503_vm1, %v3916_v19  ;;  %v812_v34 = vshll.u32 %v700_v22, 16  ;;  %v782_v36 = vrot.slane %v781_v28, 4  ;;  %v800_v42 = vrot.slane %v798_v27, 5  ;;  %v1309_v49 = vsel %vm516_vm0, %v4787_v38, 0  ;;  %v4549_v38 = vld [vmem:[%s4840_s19] ss:$8 sps:$4 sm:$0xff]  }
  0x25   : > { %4433 = vmatpush3.bf16.msra.mxu0 %v4770_v14  ;;  %v805_v37 = vrot.slane %v803_v30, 4  ;;  %v808_v39 = vrot.slane %v806_v31, 5  ;;  %v773_v40 = vsel %vm4791_vm4, %v768_v32, %v772_v15  ;;  %v795_v41 = vor.u32 %v794_v33, %v791_v29  ;;  %4424 = vmatprep.mubr.msk.bf16.mxu1 %vm503_vm1, %v4547_v35  ;;  %v1154_v58 = vld [vmem:[%s4824_s15] sm:$0xf]  ;;  %v1156_v60 = vld [vmem:[%s4824_s15 + $0x8] sm:$0xf] }
  0x26   : > { %4525 = vmatprep.subr.msk.bf16.mxu0 %vm516_vm0, %v3958_v18  ;;  %v787_v14 = vsel %vm4791_vm4, %v782_v36, %v786_v25  ;;  %v814_v46 = vrot.slane %v812_v34, 5  ;;  %v1428_v56 = vsel %vm516_vm0, %v3958_v18, 0  ;;  %v1157_v61 = vld [vmem:[%s4824_s15 + $0xc] sm:$0x1]  ;;  %v1171_v62 = vshrl.u32 %v1154_v58, 16 }
  0x27   : > { %v809_v45 = vor.u32 %v808_v39, %v805_v37  ;;  %v3917_v47 = vcombine.low %v773_v40, %v787_v14  ;;  %v796_v48 = vrot.slane %v795_v41, 4  ;;  %v1174_v63 = vshll.u32 %v1154_v58, 16  ;;  %v1158_v2 = vld [vmem:[%s4824_s15 + $0x10] sm:$0xf]  ;;  %v1159_v6 = vld [vmem:[%s4824_s15 + $0x14] sm:$0x1] }
  0x28   : > { %v1180_v0 = vshll.u32 %v1155_v59, 16  ;;  %v1185_v1 = vshrl.u32 %v1156_v60, 16  ;;  %v4550_v3 = vld [vmem:[%s4840_s19 + $0x10] ss:$8 sps:$4 sm:$0xff]   ;;  %v1188_v4 = vshll.u32 %v1156_v60, 16  ;;  %v1194_v5 = vshll.u32 %v1157_v61, 16 }
  0x29   : > { %v810_v50 = vrot.slane %v809_v45, 4  ;;  %4418 = vmatprep.mubr.msk.bf16.mxu0 %vm503_vm1, %v3917_v47  ;;  %v801_v52 = vsel %vm4791_vm4, %v796_v48, %v800_v42  ;;  %v1160_v7 = vld [vmem:[%s4824_s15 + $0x18] sm:$0xf]  ;;  %v4553_v8 = vld [vmem:[%s4840_s19 + $0x20] ss:$8 sps:$4 sm:$0xff]   ;;  %v1173_v9 = vrot.slane %v1171_v62, 4 }
  0x2a   : > { %v1176_v10 = vrot.slane %v1174_v63, 5  ;;  %v1182_v11 = vrot.slane %v1180_v0, 5  ;;  %v1187_v12 = vrot.slane %v1185_v1, 4  ;;  %v1161_v13 = vld [vmem:[%s4824_s15 + $0x1c] sm:$0x1]  ;;  %v1190_v15 = vrot.slane %v1188_v4, 5 }
  0x2b   : > { %v815_v54 = vsel %vm4791_vm4, %v810_v50, %v814_v46  ;;  %v1196_v16 = vrot.slane %v1194_v5, 5  ;;  %v1199_v17 = vshrl.u32 %v1158_v2, 16  ;;  %v1202_v18 = vshll.u32 %v1158_v2, 16  ;;  %v4877_v27 = vld [vmem:[%s5806_s4 + $0x10] sm:$0x3] }
  0x2c   : > { %4425 = vmatmul.mubr.msk.bf16.vlgmr.msra.gmra.mxu1 %vm503_vm1, %v4548_v44  ;;  %v3918_v55 = vcombine.low %v801_v52, %v815_v54  ;;  %v1177_v19 = vor.u32 %v1176_v10, %v1173_v9  ;;  %v1208_v20 = vshll.u32 %v1159_v6, 16  ;;  %v1213_v21 = vshrl.u32 %v1160_v7, 16  ;;  %v1162_v39 = vld [vmem:[%s4824_s15 + $0x20] sm:$0xf]  ;;  %v1163_v40 = vld [vmem:[%s4824_s15 + $0x24] sm:$0x1] }
  0x2d   : > { %4443 = vmatpush3.bf16.msra.mxu1 %v1309_v49  ;;  %4428 = vmatprep.mubr.msk.bf16.mxu1 %vm503_vm1, %v4551_v53  ;;  %v1216_v22 = vshll.u32 %v1160_v7, 16  ;;  %v1191_v23 = vor.u32 %v1190_v15, %v1187_v12  ;;  %v1201_v24 = vrot.slane %v1199_v17, 4  ;;  %v1204_v25 = vrot.slane %v1202_v18, 5  ;;  %v1164_v41 = vld [vmem:[%s4824_s15 + $0x28] sm:$0xf] }
  0x2e   : > { %4526 = vmatprep.subr.msk.bf16.mxu1 %vm516_vm0, %v3975_v51  ;;  %4419 = vmatmul.mubr.msk.bf16.gmra.mxu0 %vm503_vm1, %v3918_v55  ;;  %v1222_v26 = vshll.u32 %v1161_v13, 16  ;;  %v1178_v28 = vrot.slane %v1177_v19, 4  ;;  %v1215_v29 = vrot.slane %v1213_v21, 4  ;;  %v1547_v31 = vsel %vm516_vm0, %v3975_v51, 0  ;;  %v4554_v42 = vld [vmem:[%s4840_s19 + $0x30] ss:$8 sps:$4 sm:$0xff]  }
  0x2f   : > { %4434 = vmatprep.mubr.msk.bf16.mxu0 %vm503_vm1, %v4549_v38  ;;  %v1218_v30 = vrot.slane %v1216_v22, 5  ;;  %v1192_v32 = vrot.slane %v1191_v23, 4  ;;  %v1205_v33 = vor.u32 %v1204_v25, %v1201_v24  ;;  %v1210_v34 = vrot.slane %v1208_v20, 5  ;;  %v1165_v45 = vld [vmem:[%s4824_s15 + $0x2c] sm:$0x1] }
  0x30   : > { %v1224_v35 = vrot.slane %v1222_v26, 5  ;;  %v1183_v36 = vsel %vm4791_vm4, %v1178_v28, %v1182_v11  ;;  %v1227_v46 = vshrl.u32 %v1162_v39, 16  ;;  %v1230_v47 = vshll.u32 %v1162_v39, 16  ;;  %v4555_v50 = vld [vmem:[%s4761_s27 + $0x8] ss:$8 sps:$4 sm:$0xff]  }
  0x31   : > { %v1219_v37 = vor.u32 %v1218_v30, %v1215_v29  ;;  %v1197_v44 = vsel %vm4791_vm4, %v1192_v32, %v1196_v16  ;;  %v1206_v14 = vrot.slane %v1205_v33, 4  ;;  %v1236_v51 = vshll.u32 %v1163_v40, 16  ;;  %v1166_v53 = vld [vmem:[%s4824_s15 + $0x30] sm:$0xf]  ;;  %v1168_v62 = vld [vmem:[%s4824_s15 + $0x38] sm:$0xf] }
  0x32   : > { %v3942_v48 = vcombine.low %v1183_v36, %v1197_v44  ;;  %v1241_v52 = vshrl.u32 %v1164_v41, 16  ;;  %v1229_v38 = vrot.slane %v1227_v46, 4  ;;  %v1232_v55 = vrot.slane %v1230_v47, 5  ;;  %v1169_v2 = vld [vmem:[%s4824_s15 + $0x3c] sm:$0x1] }
  0x33   : > { %v1220_v49 = vrot.slane %v1219_v37, 4  ;;  %v1211_v54 = vsel %vm4791_vm4, %v1206_v14, %v1210_v34  ;;  %v1238_v59 = vrot.slane %v1236_v51, 5  ;;  %v1250_v61 = vshll.u32 %v1165_v45, 16  ;;  %v4556_v16 = vld [vmem:[%s4761_s27 + $0x18] ss:$8 sps:$4 sm:$0xff]  }
  0x34   : > { %4429 = vmatmul.mubr.msk.bf16.gmra.mxu1 %vm503_vm1, %v4552_v57  ;;  %v1167_v57 = vld [vmem:[%s4824_s15 + $0x34] sm:$0x1]  ;;  %v1243_v60 = vrot.slane %v1241_v52, 4  ;;  %v1233_v0 = vor.u32 %v1232_v55, %v1229_v38  ;;  %v1258_v5 = vshll.u32 %v1166_v53, 16  ;;  %v1269_v7 = vshrl.u32 %v1168_v62, 16 }
  0x35   : > { %4444 = vmatprep.mubr.msk.bf16.mxu1 %vm503_vm1, %v3942_v48  ;;  %v1225_v58 = vsel %vm4791_vm4, %v1220_v49, %v1224_v35  ;;  %v1252_v4 = vrot.slane %v1250_v61, 5  ;;  %v1264_v6 = vshll.u32 %v1167_v57, 16  ;;  %v1272_v11 = vshll.u32 %v1168_v62, 16  ;;  %v4557_v29 = vld [vmem:[%s4761_s27 + $0x28] ss:$8 sps:$4 sm:$0xff]  }
  0x36   : > { %4435 = vmatmul.mubr.msk.bf16.vlgmr.msra.gmra.mxu0 %vm503_vm1, %v4550_v3  ;;  %v3943_v63 = vcombine.low %v1211_v54, %v1225_v58  ;;  %v1255_v3 = vshrl.u32 %v1166_v53, 16  ;;  %v1260_v12 = vrot.slane %v1258_v5, 5  ;;  %v1271_v13 = vrot.slane %v1269_v7, 4  ;;  %v3984_v30 = vld [vmem:[%s4761_s27 + $0x8] sm:$0xf] }
  0x37   : > { %4453 = vmatpush3.bf16.msra.mxu0 %v1428_v56  ;;  %4438 = vmatprep.mubr.msk.bf16.mxu0 %vm503_vm1, %v4553_v8  ;;  %v1244_v56 = vshll.u32 %v1164_v41, 16  ;;  %v1234_v8 = vrot.slane %v1233_v0, 4  ;;  %v1278_v15 = vshll.u32 %v1169_v2, 16  ;;  %v1274_v19 = vrot.slane %v1272_v11, 5  ;;  %v4559_v32 = vld [vmem:[%s4743_s20 + $0x8] ss:$8 sps:$4 sm:$0xff]  }
  0x38   : > { %4527 = vmatprep.subr.msk.bf16.mxu0 %vm516_vm0, %v4877_v27  ;;  %v1257_v10 = vrot.slane %v1255_v3, 4  ;;  %v1266_v21 = vrot.slane %v1264_v6, 5  ;;  %v1777_v25 = vsel %vm516_vm0, %v4877_v27, 0  ;;  %v3985_v33 = vld [vmem:[%s4761_s27 + $0xc] sm:$0x1]  ;;  %v1639_v35 = vshrl.u32 %v3984_v30, 16 }
  0x39   : > { %v1246_v1 = vrot.slane %v1244_v56, 5  ;;  %v1239_v17 = vsel %vm4791_vm4, %v1234_v8, %v1238_v59  ;;  %v1275_v23 = vor.u32 %v1274_v19, %v1271_v13  ;;  %v1280_v24 = vrot.slane %v1278_v15, 5  ;;  %v3986_v34 = vld [vmem:[%s4761_s27 + $0x10] sm:$0xf]  ;;  %v3987_v37 = vld [vmem:[%s4761_s27 + $0x14] sm:$0x1] }
  0x3a   : > { %v1261_v20 = vor.u32 %v1260_v12, %v1257_v10  ;;  %v1642_v39 = vshll.u32 %v3984_v30, 16  ;;  %v1648_v27 = vshll.u32 %v3985_v33, 16  ;;  %v1653_v40 = vshrl.u32 %v3986_v34, 16  ;;  %v3988_v45 = vld [vmem:[%s4761_s27 + $0x18] sm:$0xf] }
  0x3b   : > { %v1247_v9 = vor.u32 %v1246_v1, %v1243_v60  ;;  %v1656_v44 = vshll.u32 %v3986_v34, 16  ;;  %v1662_v14 = vshll.u32 %v3987_v37, 16  ;;  %v4558_v51 = vld [vmem:[%s4761_s27 + $0x38] ss:$8 sps:$4 sm:$0xff]   ;;  %v3991_v38 = vld [vmem:[%s4761_s27 + $0x24] sm:$0x1] }
  0x3c   : > { %4445 = vmatmul.mubr.msk.bf16.vlgmr.msra.gmra.mxu1 %vm503_vm1, %v3943_v63  ;;  %v1262_v28 = vrot.slane %v1261_v20, 4  ;;  %v1644_v47 = vrot.slane %v1642_v39, 5  ;;  %v1650_v48 = vrot.slane %v1648_v27, 5  ;;  %v1655_v49 = vrot.slane %v1653_v40, 4  ;;  %v3990_v54 = vld [vmem:[%s4761_s27 + $0x20] sm:$0xf] }
  0x3d   : > { %4463 = vmatpush3.bf16.msra.mxu1 %v1547_v31  ;;  %v1248_v18 = vrot.slane %v1247_v9, 4  ;;  %v1276_v31 = vrot.slane %v1275_v23, 4  ;;  %v1658_v52 = vrot.slane %v1656_v44, 5  ;;  %v1664_v53 = vrot.slane %v1662_v14, 5  ;;  %v4560_v63 = vld [vmem:[%s4743_s20 + $0x18] ss:$8 sps:$4 sm:$0xff]  }
  0x3e   : > { %4439 = vmatmul.mubr.msk.bf16.gmra.mxu0 %vm503_vm1, %v4554_v42  ;;  %v1267_v36 = vsel %vm4791_vm4, %v1262_v28, %v1266_v21  ;;  %v1641_v42 = vrot.slane %v1639_v35, 4  ;;  %v1667_v56 = vshrl.u32 %v3988_v45, 16  ;;  %v1670_v57 = vshll.u32 %v3988_v45, 16  ;;  %v4561_v6 = vld [vmem:[%s4743_s20 + $0x28] ss:$8 sps:$4 sm:$0xff]  }
  0x3f   : > { %4454 = vmatprep.mubr.msk.bf16.mxu0 %vm503_vm1, %v4555_v50  ;;  %v1253_v22 = vsel %vm4791_vm4, %v1248_v18, %v1252_v4  ;;  %v1281_v41 = vsel %vm4791_vm4, %v1276_v31, %v1280_v24  ;;  %v3989_v50 = vld [vmem:[%s4761_s27 + $0x1c] sm:$0x1]  ;;  %v1659_v59 = vor.u32 %v1658_v52, %v1655_v49  ;;  %v1681_v60 = vshrl.u32 %v3990_v54, 16  ;;  %v3992_v11 = vld [vmem:[%s4761_s27 + $0x28] sm:$0xf] }
  0x40   : > { %v3944_v26 = vcombine.low %v1239_v17, %v1253_v22  ;;  %v3945_v46 = vcombine.low %v1267_v36, %v1281_v41  ;;  %v1645_v55 = vor.u32 %v1644_v47, %v1641_v42  ;;  %v1676_v58 = vshll.u32 %v3989_v50, 16  ;;  %v3993_v15 = vld [vmem:[%s4761_s27 + $0x2c] sm:$0x1]  ;;  %v3995_v17 = vld [vmem:[%s4761_s27 + $0x34] sm:$0x1] }
  0x41   : > { %v1684_v61 = vshll.u32 %v3990_v54, 16  ;;  %v1690_v62 = vshll.u32 %v3991_v38, 16  ;;  %v1669_v1 = vrot.slane %v1667_v56, 4  ;;  %v1672_v2 = vrot.slane %v1670_v57, 5  ;;  %v3996_v22 = vld [vmem:[%s4761_s27 + $0x38] sm:$0xf] }
  0x42   : > { %4448 = vmatprep.mubr.msk.bf16.mxu1 %vm503_vm1, %v3944_v26  ;;  %v1646_v0 = vrot.slane %v1645_v55, 4  ;;  %v1660_v3 = vrot.slane %v1659_v59, 4  ;;  %v1683_v4 = vrot.slane %v1681_v60, 4  ;;  %v1678_v9 = vrot.slane %v1676_v58, 5  ;;  %v3997_v28 = vld [vmem:[%s4761_s27 + $0x3c] sm:$0x1] }
  0x43   : > { %v1686_v5 = vrot.slane %v1684_v61, 5  ;;  %v1673_v8 = vor.u32 %v1672_v2, %v1669_v1  ;;  %v1692_v10 = vrot.slane %v1690_v62, 5  ;;  %v1695_v20 = vshrl.u32 %v3992_v11, 16  ;;  %v3998_v33 = vld [vmem:[%s4761_s27 + $0x40] sm:$0xf] }
  0x44   : > { %4449 = vmatmul.mubr.msk.bf16.gmra.mxu1 %vm503_vm1, %v3945_v46  ;;  %v1651_v7 = vsel %vm4791_vm4, %v1646_v0, %v1650_v48  ;;  %v1665_v12 = vsel %vm4791_vm4, %v1660_v3, %v1664_v53  ;;  %v1698_v21 = vshll.u32 %v3992_v11, 16  ;;  %v1704_v24 = vshll.u32 %v3993_v15, 16  ;;  %v3999_v39 = vld [vmem:[%s4761_s27 + $0x44] sm:$0x1]  ;;  %v4562_v40 = vld [vmem:[%s4743_s20 + $0x38] ss:$8 sps:$4 sm:$0xff]  }
  0x45   : > { %4464 = vmatprep.mubr.msk.bf16.mxu1 %vm503_vm1, %v4559_v32  ;;  %v1687_v13 = vor.u32 %v1686_v5, %v1683_v4  ;;  %v4001_v18 = vcombine.low %v1651_v7, %v1665_v12  ;;  %v1674_v19 = vrot.slane %v1673_v8, 4  ;;  %v1697_v30 = vrot.slane %v1695_v20, 4  ;;  %v2914_v3 = vld [vmem:[%s5810_s8] sm:$0x3]  ;;  %v411_v5 = vld [vmem:[#allocation2 + $0x18] sm:$0x1] }
  0x46   : > { %4455 = vmatmul.mubr.msk.bf16.vlgmr.msra.gmra.mxu0 %vm503_vm1, %v4556_v16  ;;  %v3994_v16 = vld [vmem:[%s4761_s27 + $0x30] sm:$0xf]  ;;  %v1700_v31 = vrot.slane %v1698_v21, 5  ;;  %v1718_v32 = vshll.u32 %v3995_v17, 16  ;;  %v1706_v35 = vrot.slane %v1704_v24, 5  ;;  %v1723_v44 = vshrl.u32 %v3996_v22, 16  ;;  %4528 = vmatprep.subr.msk.bf16.mxu1 %vm516_vm0, %v2914_v3 }
  0x47   : > { %4473 = vmatpush3.bf16.msra.mxu0 %v1777_v25  ;;  %4458 = vmatprep.mubr.msk.bf16.mxu0 %vm503_vm1, %v4557_v29  ;;  %v1688_v23 = vrot.slane %v1687_v13, 4  ;;  %v1709_v25 = vshrl.u32 %v3994_v16, 16  ;;  %v1712_v26 = vshll.u32 %v3994_v16, 16  ;;  %v1679_v29 = vsel %vm4791_vm4, %v1674_v19, %v1678_v9  ;;  %v443_v7 = vld [vmem:[#allocation2 + $0x1c] sm:$0x1]  ;;  %v4568_v16 = vld [vmem:[%s5808_s6 + $0xf0] sm:$0xff]  }
  0x48   : > { %v1701_v41 = vor.u32 %v1700_v31, %v1697_v30  ;;  %v1720_v42 = vrot.slane %v1718_v32, 5  ;;  %v1726_v45 = vshll.u32 %v3996_v22, 16  ;;  %v1732_v46 = vshll.u32 %v3997_v28, 16  ;;  %v4564_v12 = vld [vmem:[%s5808_s6 + $0xf8] sm:$0xff]   ;;  %v405_v20 = vld [vmem:[#allocation2 + $0x8] sm:$0x1] }
  0x49   : > { %v1693_v34 = vsel %vm4791_vm4, %v1688_v23, %v1692_v10  ;;  %v1711_v36 = vrot.slane %v1709_v25, 4  ;;  %v1714_v37 = vrot.slane %v1712_v26, 5  ;;  %v1737_v47 = vshrl.u32 %v3998_v33, 16  ;;  %v4563_v10 = vld [vmem:[%s4840_s19] ss:$8 sps:$4 sm:$0xff]   ;;  %v4566_v15 = vld [vmem:[%s5808_s6 + $0xb8] sm:$0xff]  }
  0x4a   : > { %v4002_v27 = vcombine.low %v1679_v29, %v1693_v34  ;;  %v1702_v48 = vrot.slane %v1701_v41, 4  ;;  %v1725_v49 = vrot.slane %v1723_v44, 4  ;;  %v1740_v50 = vshll.u32 %v3998_v33, 16  ;;  %v4565_v13 = vld [vmem:[%s4840_s19 + $0x10] ss:$8 sps:$4 sm:$0xff]   ;;  %v4572_v26 = vld [vmem:[%s5808_s6 + $0xe8] sm:$0xff]  }
  0x4b   : > { %v1715_v14 = vor.u32 %v1714_v37, %v1711_v36  ;;  %v1728_v53 = vrot.slane %v1726_v45, 5  ;;  %v1734_v54 = vrot.slane %v1732_v46, 5  ;;  %v1739_v38 = vrot.slane %v1737_v47, 4  ;;  %v4567_v17 = vld [vmem:[%s5808_s6 + $0x78] sm:$0xff]   ;;  %v437_v21 = vld [vmem:[#allocation2 + $0xc] sm:$0x1] }
  0x4c   : > { %4465 = vmatmul.mubr.msk.bf16.vlgmr.msra.gmra.mxu1 %vm503_vm1, %v4560_v63  ;;  %v1707_v55 = vsel %vm4791_vm4, %v1702_v48, %v1706_v35  ;;  %v1742_v56 = vrot.slane %v1740_v50, 5  ;;  %v2948_v4 = vsel %vm516_vm0, %v2914_v3, 0  ;;  %v412_v8 = vsel %vm4973_vm7, 0, %v411_v5  ;;  %v4569_v19 = vld [vmem:[%s5808_s6 + $0x38] sm:$0xff]   ;;  %4220 = vmatprep.subr.bf16.mxu0 %v4567_v17  ;;  %v414_v24 = vld [vmem:[#allocation2 + $0x20] sm:$0x1] }
  0x4d   : > { %4468 = vmatprep.mubr.msk.bf16.mxu1 %vm503_vm1, %v4561_v6  ;;  %v1716_v52 = vrot.slane %v1715_v14, 4  ;;  %v1729_v59 = vor.u32 %v1728_v53, %v1725_v49  ;;  %4483 = vmatpush3.bf16.msra.mxu1 %v2948_v4  ;;  %413 = vst [vmem:[#allocation2 + $0x18] sm:$0x1] %v412_v8  ;;  %v444_v11 = vsel %vm4980_vm9, 0, %v443_v7  ;;  %v406_v22 = vsel %vm4973_vm7, 0, %v405_v20  ;;  %v4571_v30 = vld [vmem:[%s5808_s6 + $0x70] sm:$0xff]  }
  0x4e   : > { %4459 = vmatmul.mubr.msk.bf16.gmra.mxu0 %vm503_vm1, %v4558_v51  ;;  %v1746_v51 = vshll.u32 %v3999_v39, 16  ;;  %v1743_v61 = vor.u32 %v1742_v56, %v1739_v38  ;;  %445 = vst [vmem:[#allocation2 + $0x1c] sm:$0x1] %v444_v11  ;;  %4260 = vmatprep.subr.bf16.mxu1 %v4564_v12  ;;  %v438_v23 = vsel %vm4980_vm9, 0, %v437_v21  ;;  %407 = vst [vmem:[#allocation2 + $0x8] sm:$0x1] %v406_v22 }
  0x4f   : > { %4474 = vmatprep.mubr.msk.bf16.mxu0 %vm503_vm1, %v4001_v18  ;;  %v1721_v58 = vsel %vm4791_vm4, %v1716_v52, %v1720_v42  ;;  %v1730_v62 = vrot.slane %v1729_v59, 4  ;;  %v4570_v18 = vld [vmem:[%s5808_s6 + $0xb0] sm:$0xff]   ;;  %439 = vst [vmem:[#allocation2 + $0xc] sm:$0x1] %v438_v23  ;;  %v446_v25 = vld [vmem:[#allocation2 + $0x24] sm:$0x1] }
  0x50   : > { %v1748_v57 = vrot.slane %v1746_v51, 5  ;;  %v4003_v60 = vcombine.low %v1707_v55, %v1721_v58  ;;  %v1744_v63 = vrot.slane %v1743_v61, 4  ;;  %v415_v28 = vsel %vm4973_vm7, 0, %v414_v24  ;;  %v4574_v31 = vld [vmem:[%s5808_s6 + $0xa8] sm:$0xff]   ;;  %v408_v32 = vld [vmem:[#allocation2 + $0x10] sm:$0x1] }
  0x51   : > { %v1735_v0 = vsel %vm4791_vm4, %v1730_v62, %v1734_v54  ;;  %v447_v29 = vsel %vm4980_vm9, 0, %v446_v25  ;;  %416 = vst [vmem:[#allocation2 + $0x20] sm:$0x1] %v415_v28  ;;  %v4573_v33 = vld [vmem:[%s5808_s6 + $0x30] sm:$0xff]   ;;  %v409_v34 = vsel %vm4973_vm7, 0, %v408_v32  ;;  %v4576_v42 = vld [vmem:[%s5808_s6 + $0xe0] sm:$0xff]  }
  0x52   : > { %v1749_v1 = vsel %vm4791_vm4, %v1744_v63, %v1748_v57  ;;  %448 = vst [vmem:[#allocation2 + $0x24] sm:$0x1] %v447_v29  ;;  %v440_v35 = vld [vmem:[#allocation2 + $0x14] sm:$0x1]  ;;  %410 = vst [vmem:[#allocation2 + $0x10] sm:$0x1] %v409_v34 }
  0x53   : > { %v4004_v2 = vcombine.low %v1735_v0, %v1749_v1  ;;  %v441_v36 = vsel %vm4980_vm9, 0, %v440_v35  ;;  %v423_v37 = vld [vmem:[#allocation2 + $0x38] sm:$0x1]  ;;  %v455_v39 = vld [vmem:[#allocation2 + $0x3c] sm:$0x1]  ;;  %v4575_v44 = vld [vmem:[%s5808_s6 + $0x68] sm:$0xff]  }
  0x54   : > { %4469 = vmatmul.mubr.msk.bf16.gmra.mxu1 %vm503_vm1, %v4562_v40  ;;  %442 = vst [vmem:[#allocation2 + $0x14] sm:$0x1] %v441_v36  ;;  %v424_v40 = vsel %vm4973_vm7, 0, %v423_v37  ;;  %v456_v41 = vsel %vm4980_vm9, 0, %v455_v39  ;;  %v4578_v14 = vld [vmem:[%s5808_s6 + $0xa0] sm:$0xff]   ;;  %v4577_v45 = vld [vmem:[%s5808_s6 + $0x28] sm:$0xff]  }
  0x55   : > { %4484 = vmatprep.mubr.msk.bf16.mxu1 %vm503_vm1, %v4563_v10  ;;  %425 = vst [vmem:[#allocation2 + $0x38] sm:$0x1] %v424_v40  ;;  %457 = vst [vmem:[#allocation2 + $0x3c] sm:$0x1] %v456_v41  ;;  %v417_v46 = vld [vmem:[#allocation2 + $0x28] sm:$0x1] }
  0x56   : > { %4475 = vmatmul.mubr.msk.bf16.vlgmr.msra.gmra.mxu0 %vm503_vm1, %v4002_v27  ;;  %v4661_v27 = vmov 0   ;;  %v449_v47 = vld [vmem:[#allocation2 + $0x2c] sm:$0x1]  ;;  %v418_v48 = vsel %vm4973_vm7, 0, %v417_v46  ;;  %v426_v50 = vld [vmem:[#allocation2 + $0x40] sm:$0x1] }
  0x57   : > { %4478 = vmatprep.mubr.msk.bf16.mxu0 %vm503_vm1, %v4003_v60  ;;  %4221 = vmatpush3.bf16.msra.mxu0 %v4569_v19  ;;  %394 = vst [vmem:[#allocation2] sm:$0xf] %v4661_v27  ;;  %395 = vst [vmem:[#allocation2 + $0x4] sm:$0x1] %v4661_v27  ;;  %v450_v49 = vsel %vm4980_vm9, 0, %v449_v47  ;;  %v4579_v52 = vld [vmem:[%s5808_s6 + $0x60] sm:$0xff]  }
  0x58   : > { %4222 = vmatprep.subr.bf16.mxu0 %v4571_v30  ;;  %397 = vst [vmem:[#allocation2 + $0x48] sm:$0xf] %v4661_v27  ;;  %398 = vst [vmem:[#allocation2 + $0x4c] sm:$0x1] %v4661_v27  ;;  %v458_v51 = vld [vmem:[#allocation2 + $0x44] sm:$0x1] }
  0x59   : > { %419 = vst [vmem:[#allocation2 + $0x28] sm:$0x1] %v418_v48  ;;  %451 = vst [vmem:[#allocation2 + $0x2c] sm:$0x1] %v450_v49  ;;  %v427_v53 = vsel %vm4973_vm7, 0, %v426_v50  ;;  %v459_v54 = vsel %vm4980_vm9, 0, %v458_v51 }
  0x5a   : > { %v4580_v38 = vld [vmem:[%s5808_s6 + $0xd8] sm:$0xff]   ;;  %v4581_v55 = vld [vmem:[%s5808_s6 + $0x20] sm:$0xff]   ;;  %428 = vst [vmem:[#allocation2 + $0x40] sm:$0x1] %v427_v53  ;;  %460 = vst [vmem:[#allocation2 + $0x44] sm:$0x1] %v459_v54 }
  0x5b   : > { %4223 = vmatpush3.bf16.msra.mxu0 %v4573_v33  ;;  %v4582_v56 = vld [vmem:[%s5808_s6 + $0x98] sm:$0xff]   ;;  %v420_v58 = vld [vmem:[#allocation2 + $0x30] sm:$0x1]  ;;  %v452_v59 = vld [vmem:[#allocation2 + $0x34] sm:$0x1] }
  0x5c   : > { %4485 = vmatmul.mubr.msk.bf16.vlgmr.msra.gmra.mxu1 %vm503_vm1, %v4565_v13  ;;  %4224 = vmatprep.subr.bf16.mxu0 %v4575_v44  ;;  %v4584_v60 = vld [vmem:[%s5808_s6 + $0xd0] sm:$0xff]   ;;  %v421_v62 = vsel %vm4973_vm7, 0, %v420_v58  ;;  %v453_v63 = vsel %vm4980_vm9, 0, %v452_v59  ;;  %v4583_v0 = vld [vmem:[%s5808_s6 + $0x58] sm:$0xff]   ;;  %v4587_v4 = vld [vmem:[%s4840_s19 + $0x20] ss:$8 sps:$4 sm:$0xff]  }
  0x5d   : > { %4261 = vmatpush3.bf16.msra.mxu1 %v4566_v15  ;;  %v4586_v1 = vld [vmem:[%s5808_s6 + $0x90] sm:$0xff]   ;;  %422 = vst [vmem:[#allocation2 + $0x30] sm:$0x1] %v421_v62  ;;  %454 = vst [vmem:[#allocation2 + $0x34] sm:$0x1] %v453_v63  ;;  %4488 = vmatprep.mubr.msk.bf16.mxu1 %vm503_vm1, %v4587_v4  ;;  %v4590_v10 = vld [vmem:[%s5808_s6 + $0xc8] sm:$0xff]  }
  0x5e   : > { %4479 = vmatmul.mubr.msk.bf16.gmra.mxu0 %vm503_vm1, %v4004_v2  ;;  %4262 = vmatprep.subr.bf16.mxu1 %v4568_v16  ;;  %v434_v57 = vld [vmem:[#allocation2 + $0x4] sm:$0x1]  ;;  %v4585_v2 = vld [vmem:[%s5808_s6 + $0x18] sm:$0xff]   ;;  %v402_v3 = vld [vmem:[#allocation2] sm:$0x1] }
  0x5f   : > { %4225 = vmatpush3.bf16.msra.mxu0 %v4577_v45  ;;  %v435_v61 = vsel %vm4980_vm9, 0, %v434_v57  ;;  %v403_v5 = vsel %vm4973_vm7, 0, %v402_v3  ;;  %v4588_v7 = vld [vmem:[%s4840_s19 + $0x30] ss:$8 sps:$4 sm:$0xff]   ;;  %v4592_v11 = vld [vmem:[%s5808_s6 + $0x88] sm:$0xff]   ;;  %v4594_v13 = vld [vmem:[%s5808_s6 + $0xc0] sm:$0xff]  }
  0x60   : > { %4226 = vmatprep.subr.bf16.mxu0 %v4579_v52  ;;  %436 = vst [vmem:[#allocation2 + $0x4] sm:$0x1] %v435_v61  ;;  %404 = vst [vmem:[#allocation2] sm:$0x1] %v403_v5  ;;  %v4589_v8 = vld [vmem:[%s5808_s6 + $0x50] sm:$0xff]   ;;  %v4593_v15 = vld [vmem:[%s5808_s6 + $0x48] sm:$0xff]  }
  0x61   : > { %4263 = vmatpush3.bf16.msra.mxu1 %v4570_v18  ;;  %v4591_v12 = vld [vmem:[%s5808_s6 + $0x10] sm:$0xff]   ;;  %v4595_v16 = vld [vmem:[%s5808_s6 + $0x8] sm:$0xff]   ;;  %v4596_v17 = vld [vmem:[%s5808_s6 + $0x80] sm:$0xff]   ;;  %s4161_s19 = sshll.u32 %s5843_s10, 6 }
  0x62   : > { %4264 = vmatprep.subr.bf16.mxu1 %v4572_v26  ;;  %v4599_v18 = vld [vmem:[%s5808_s6 + $0x1f8] sm:$0xff]   ;;  %v4598_v19 = vld [vmem:[%s5808_s6 + $0x40] sm:$0xff]   ;;  %v461_v45 = vld [vmem:[#allocation2 + $0x4c] sm:$0x1]  ;;  %s5781_s25 = scalar_lea.vmem %s5811_s9, %s4161_s19 }
  0x63   : > { %4227 = vmatpush3.bf16.msra.mxu0 %v4581_v55  ;;  %v4600_v20 = vld [vmem:[%s5808_s6] sm:$0xff]   ;;  %v4603_v21 = vld [vmem:[%s5808_s6 + $0x178] sm:$0xff]   ;;  %v462_v48 = vsel %vm4980_vm9, 0, %v461_v45 }
  0x64   : > { %4228 = vmatprep.subr.bf16.mxu0 %v4583_v0  ;;  %4489 = vmatmul.mubr.msk.bf16.gmra.mxu1 %vm503_vm1, %v4588_v7  ;;  %463 = vst [vmem:[#allocation2 + $0x4c] sm:$0x1] %v462_v48 }
  0x65   : > { %4265 = vmatpush3.bf16.msra.mxu1 %v4574_v31 }
  0x66   : > { %4266 = vmatprep.subr.bf16.mxu1 %v4576_v42 }
  0x67   : > { %4229 = vmatpush3.bf16.msra.mxu0 %v4585_v2 }
  0x68   : > { %4230 = vmatprep.subr.bf16.mxu0 %v4589_v8 }
  0x69   : > { %4267 = vmatpush3.bf16.msra.mxu1 %v4578_v14  ;;  %v429_v14 = vld [vmem:[#allocation2 + $0x48] sm:$0x1] }
  0x6a   : > { %4268 = vmatprep.subr.bf16.mxu1 %v4580_v38  ;;  %v430_v47 = vsel %vm4973_vm7, 0, %v429_v14 }
  0x6b   : > { %4231 = vmatpush3.bf16.msra.mxu0 %v4591_v12  ;;  %431 = vst [vmem:[#allocation2 + $0x48] sm:$0x1] %v430_v47 }
  0x6c   : > { %4232 = vmatprep.subr.bf16.mxu0 %v4593_v15 }
  0x6d   : > { %4269 = vmatpush3.bf16.msra.mxu1 %v4582_v56 }
  0x6e   : > { %4270 = vmatprep.subr.bf16.mxu1 %v4584_v60 }
  0x6f   : > { %4233 = vmatpush3.bf16.msra.mxu0 %v4595_v16 }
  0x70   : > { %4234 = vmatprep.subr.bf16.mxu0 %v4598_v19 }
  0x71   : > { %4271 = vmatpush3.bf16.msra.mxu1 %v4586_v1 }
  0x72   : > { %4272 = vmatprep.subr.bf16.mxu1 %v4590_v10 }
  0x73   : > { %4235 = vmatpush3.bf16.msra.mxu0 %v4600_v20 }
  0x74   : > { %4300 = vmatprep.subr.bf16.mxu0 %v4603_v21 }
  0x75   : > { %4273 = vmatpush3.bf16.msra.mxu1 %v4592_v11 }
  0x76   : > { %4274 = vmatprep.subr.bf16.mxu1 %v4594_v13 }
  0x79   : > { %4275 = vmatpush3.bf16.msra.mxu1 %v4596_v17 }
  0x7a   : > { %4340 = vmatprep.subr.bf16.mxu1 %v4599_v18 }
  0xd3   : > { %v4396_v24 = vpop.f32.mrf.mxu0 }
  0xd4   : > { %v5128_v22 = vpop.f32.mrf.mxu1 }
  0xd5   : > { %v554_v28 = vpop.f32.mrf.mxu0 }
  0xd6   : > { %v5130_v23 = vpop.f32.mrf.mxu1 }
  0xd7   : > { %v4397_v31 = vpop.f32.mrf.mxu0 }
  0xd8   : > { %v5132_v25 = vpop.f32.mrf.mxu1 }
  0xd9   : > { %v557_v34 = vpop.f32.mrf.mxu0 }
  0xda   : > { %v5134_v26 = vpop.f32.mrf.mxu1 }
  0xdc   : > { %v4406_v29 = vpop.f32.mrf.mxu1 }
  0xdd   : > { %v663_v1 = vadd.f32 %v4406_v29, %v4396_v24 }
  0xde   : > { %v654_v30 = vpop.f32.mrf.mxu1 }
  0xdf   : > { %v655_v4 = vadd.f32 %v654_v30, %v554_v28 }
  0xe0   : > { %v4407_v32 = vpop.f32.mrf.mxu1 }
  0xe1   : > { %v666_v8 = vadd.f32 %v4407_v32, %v4397_v31 }
  0xe2   : > { %v657_v33 = vpop.f32.mrf.mxu1 }
  0xe3   : > { %v658_v13 = vadd.f32 %v657_v33, %v557_v34 }
  0xe4   : > { %v4410_v35 = vpop.f32.mrf.mxu1  ;;  %v4416_v36 = vpop.f32.mrf.mxu0 }
  0xe5   : > { %v912_v7 = vadd.f32 %v4416_v36, %v663_v1  ;;  %v679_v28 = vadd.f32 %v4410_v35, %v5128_v22 }
  0xe6   : > { %v670_v37 = vpop.f32.mrf.mxu1  ;;  %v879_v39 = vpop.f32.mrf.mxu0 }
  0xe7   : > { %v910_v12 = vadd.f32 %v879_v39, %v655_v4  ;;  %v671_v33 = vadd.f32 %v670_v37, %v5130_v23 }
  0xe8   : > { %v4411_v27 = vpop.f32.mrf.mxu1  ;;  %v4417_v40 = vpop.f32.mrf.mxu0 }
  0xe9   : > { %v913_v17 = vadd.f32 %v4417_v40, %v666_v8  ;;  %v682_v34 = vadd.f32 %v4411_v27, %v5132_v25 }
  0xea   : > { %v5136_v41 = vpop.f32.mrf.mxu1  ;;  %v882_v42 = vpop.f32.mrf.mxu0 }
  0xeb   : > { %v911_v21 = vadd.f32 %v882_v42, %v658_v13  ;;  %v674_v22 = vadd.f32 %v5136_v41, %v5134_v26 }
  0xec   : > { %v4426_v44 = vpop.f32.mrf.mxu1 }
  0xed   : > { %v1030_v15 = vadd.f32 %v4426_v44, %v912_v7 }
  0xee   : > { %v997_v46 = vpop.f32.mrf.mxu1  ;;  %v4420_v49 = vpop.f32.mrf.mxu0 }
  0xef   : > { %v1028_v18 = vadd.f32 %v997_v46, %v910_v12  ;;  %v5171_v46 = vld [vmem:[#allocation2] sm:$0xf]  ;;  %v916_v47 = vadd.f32 %v4420_v49, %v679_v28 }
  0xf0   : > { %v4427_v50 = vpop.f32.mrf.mxu1  ;;  %v895_v51 = vpop.f32.mrf.mxu0  ;;  %v2058_v41 = vshll.u32 %v5171_v46, 16 }
  0xf1   : > { %v1031_v29 = vadd.f32 %v4427_v50, %v913_v17  ;;  %v914_v25 = vadd.f32 %v895_v51, %v671_v33 }
  0xf2   : > { %v1000_v52 = vpop.f32.mrf.mxu1  ;;  %v4421_v53 = vpop.f32.mrf.mxu0 }
  0xf3   : > { %v1029_v32 = vadd.f32 %v1000_v52, %v911_v21  ;;  %v917_v37 = vadd.f32 %v4421_v53, %v682_v34 }
  0xf4   : > { %v4430_v54 = vpop.f32.mrf.mxu1  ;;  %v5142_v38 = vpop.f32.mrf.mxu0 }
  0xf5   : > { %v1034_v27 = vadd.f32 %v4430_v54, %v916_v47 }
  0xf6   : > { %v5144_v55 = vpop.f32.mrf.mxu1  ;;  %v4436_v56 = vpop.f32.mrf.mxu0 }
  0xf7   : > { %v1148_v24 = vadd.f32 %v4436_v56, %v1030_v15 }
  0xf8   : > { %v5146_v57 = vpop.f32.mrf.mxu1  ;;  %v1115_v58 = vpop.f32.mrf.mxu0 }
  0xf9   : > { %v1146_v31 = vadd.f32 %v1115_v58, %v1028_v18  ;;  %v2046_v58 = vld [vmem:[#allocation2 + $0x4] sm:$0x1]  ;;  %v1035_v51 = vadd.f32 %v5146_v57, %v917_v37  ;;  %v5193_v18 = vrot.slane %v2058_v41, 5 }
  0xfa   : > { %v4437_v59 = vpop.f32.mrf.mxu0  ;;  %v5148_v60 = vpop.f32.mrf.mxu1  ;;  %v2064_v28 = vshll.u32 %v2046_v58, 16 }
  0xfb   : > { %v1149_v44 = vadd.f32 %v4437_v59, %v1031_v29  ;;  %v2166_v59 = vld [vmem:[#allocation2] sm:$0xe] }
  0xfc   : > { %v1118_v9 = vpop.f32.mrf.mxu0  ;;  %v4446_v62 = vpop.f32.mrf.mxu1  ;;  %v4018_v8 = vrot.slane %v2166_v59, 9  ;;  %v5217_v37 = vrot.slane %v2064_v28, 5  ;;  %v1993_v28 = vld [vmem:[#allocation2 + $0xc] sm:$0x1] }
  0xfd   : > { %v1378_v36 = vadd.f32 %v4446_v62, %v1148_v24  ;;  %v1147_v48 = vadd.f32 %v1118_v9, %v1029_v32  ;;  %v2055_v62 = vshrl.u32 %v5171_v46, 16  ;;  %v915_v9 = vadd.f32 %v5142_v38, %v674_v22  ;;  %v5189_v38 = vld [vmem:[%s5807_s5] ss:$0 sm:$0xff] }
  0xfe   : > { %v5150_v61 = vpop.f32.mrf.mxu0  ;;  %v1345_v0 = vpop.f32.mrf.mxu1 }
  0xff   : > { %v1376_v42 = vadd.f32 %v1345_v0, %v1146_v31  ;;  %v1152_v12 = vadd.f32 %v5150_v61, %v1034_v27 }
 0x100   : > { %v5152_v63 = vpop.f32.mrf.mxu0  ;;  %v4447_v3 = vpop.f32.mrf.mxu1 }
 0x101   : > { %v1379_v52 = vadd.f32 %v4447_v3, %v1149_v44  ;;  %v1032_v3 = vadd.f32 %v5144_v55, %v914_v25  ;;  %v5191_v55 = vrot.slane %v2055_v62, 4 }
 0x102   : > { %v5154_v2 = vpop.f32.mrf.mxu0  ;;  %v1348_v10 = vpop.f32.mrf.mxu1 }
 0x103   : > { %v1377_v0 = vadd.f32 %v1348_v10, %v1147_v48  ;;  %v1033_v10 = vadd.f32 %v5148_v60, %v915_v9  ;;  %v1150_v61 = vadd.f32 %v5152_v63, %v1032_v3  ;;  %v1153_v60 = vadd.f32 %v5154_v2, %v1035_v51 }
 0x104   : > { %v5156_v5 = vpop.f32.mrf.mxu0  ;;  %v5158_v19 = vpop.f32.mrf.mxu1 }
 0x105   : > { %v1382_v21 = vadd.f32 %v5158_v19, %v1152_v12  ;;  %v1151_v2 = vadd.f32 %v5156_v5, %v1033_v10  ;;  %v2061_v5 = vor.u32 %v5193_v18, %v5191_v55  ;;  %v2002_v10 = vld [vmem:[#allocation2 + $0x18] sm:$0xf] }
 0x106   : > { %v4456_v11 = vpop.f32.mrf.mxu0  ;;  %v5160_v14 = vpop.f32.mrf.mxu1 }
 0x107   : > { %v1497_v50 = vadd.f32 %v4456_v11, %v1378_v36  ;;  %v2195_v11 = vrot.slane %v2046_v58, 5  ;;  %v1380_v19 = vadd.f32 %v5160_v14, %v1150_v61 }
 0x108   : > { %v1464_v16 = vpop.f32.mrf.mxu0  ;;  %v5163_v39 = vpop.f32.mrf.mxu1 }
 0x109   : > { %v1495_v49 = vadd.f32 %v1464_v16, %v1376_v42  ;;  %v5207_v63 = vsel %vm5200_vm13, %v4018_v8, %v2195_v11  ;;  %v1383_v33 = vadd.f32 %v5163_v39, %v1153_v60 }
 0x10a   : > { %v4457_v20 = vpop.f32.mrf.mxu0  ;;  %v5169_v45 = vpop.f32.mrf.mxu1 }
 0x10b   : > { %v1498_v54 = vadd.f32 %v4457_v20, %v1379_v52  ;;  %v2417_v20 = vld [vmem:[#allocation2 + $0x48] sm:$0xf] }
 0x10c   : > { %v1467_v30 = vpop.f32.mrf.mxu0  ;;  %v4466_v23 = vpop.f32.mrf.mxu1  ;;  %v2525_v44 = vshrl.u32 %v2417_v20, 16 }
 0x10d   : > { %v1616_v1 = vadd.f32 %v4466_v23, %v1497_v50  ;;  %v1496_v57 = vadd.f32 %v1467_v30, %v1377_v0  ;;  %v2528_v50 = vshll.u32 %v2417_v20, 16  ;;  %v1381_v23 = vadd.f32 %v5169_v45, %v1151_v2 }
 0x10e   : > { %v5167_v40 = vpop.f32.mrf.mxu0  ;;  %v1583_v26 = vpop.f32.mrf.mxu1 }
 0x10f   : > { %v1614_v4 = vadd.f32 %v1583_v26, %v1495_v49  ;;  %v1501_v52 = vadd.f32 %v5167_v40, %v1382_v21  ;;  %v5222_v40 = vrot.slane %v2525_v44, 4  ;;  %v5224_v9 = vrot.slane %v2528_v50, 5 }
 0x110   : > { %v5175_v35 = vpop.f32.mrf.mxu0  ;;  %v4467_v7 = vpop.f32.mrf.mxu1 }
 0x111   : > { %v1617_v16 = vadd.f32 %v4467_v7, %v1498_v54  ;;  %v1499_v62 = vadd.f32 %v5175_v35, %v1380_v19 }
 0x112   : > { %v5177_v56 = vpop.f32.mrf.mxu0  ;;  %v1586_v17 = vpop.f32.mrf.mxu1 }
 0x113   : > { %v1615_v32 = vadd.f32 %v1586_v17, %v1496_v57  ;;  %v1502_v49 = vadd.f32 %v5177_v56, %v1383_v33 }
 0x114   : > { %v1483_v53 = vpop.f32.mrf.mxu0  ;;  %v4470_v36 = vpop.f32.mrf.mxu1 }
 0x115   : > { %v1620_v0 = vadd.f32 %v4470_v36, %v1501_v52  ;;  %v1500_v3 = vadd.f32 %v1483_v53, %v1381_v23 }
 0x116   : > { %v4476_v13 = vpop.f32.mrf.mxu0  ;;  %v1599_v48 = vpop.f32.mrf.mxu1 }
 0x117   : > { %v1846_v15 = vadd.f32 %v4476_v13, %v1616_v1  ;;  %v1618_v54 = vadd.f32 %v1599_v48, %v1499_v62  ;;  %v2005_v13 = vld [vmem:[#allocation2 + $0x1c] sm:$0x1] }
 0x118   : > { %v1813_v24 = vpop.f32.mrf.mxu0  ;;  %v4471_v59 = vpop.f32.mrf.mxu1 }
 0x119   : > { %v1861_v30 = vadd.f32 %v5189_v38, %v1846_v15  ;;  %v1844_v31 = vadd.f32 %v1813_v24, %v1614_v4  ;;  %v1621_v7 = vadd.f32 %v4471_v59, %v1502_v49  ;;  %v1990_v24 = vld [vmem:[#allocation2 + $0x8] sm:$0xf] }
 0x11a   : > { %v4477_v34 = vpop.f32.mrf.mxu0  ;;  %v1602_v41 = vpop.f32.mrf.mxu1 }
 0x11b   : > { %v1869_v42 = vmax.f32 %v1861_v30, 0.0  ;;  %v1859_v47 = vadd.f32 %v5189_v38, %v1844_v31  ;;  %v1847_v22 = vadd.f32 %v4477_v34, %v1617_v16  ;;  %v1619_v17 = vadd.f32 %v1602_v41, %v1500_v3 }
 0x11c   : > { %v1816_v25 = vpop.f32.mrf.mxu0 }
 0x11d   : > { %v4164_v14 = vpack.c.bf16 %v1869_v42, %v1869_v42  ;;  %v1867_v39 = vmax.f32 %v1859_v47, 0.0  ;;  %v1862_v27 = vadd.f32 %v5189_v38, %v1847_v22  ;;  %v1845_v58 = vadd.f32 %v1816_v25, %v1615_v32  ;;  %v2008_v25 = vld [vmem:[#allocation2 + $0x20] sm:$0xf] }
 0x11e   : > { %v4480_v4 = vpop.f32.mrf.mxu0 }
 0x11f   : > { %v1924_v45 = vshrl.u32 %v4164_v14, 16  ;;  %v4162_v1 = vpack.c.bf16 %v1867_v39, %v1867_v39  ;;  %v1870_v26 = vmax.f32 %v1862_v27, 0.0  ;;  %v1860_v51 = vadd.f32 %v5189_v38, %v1845_v58 }
 0x120   : > { %v1927_v11 = vshll.u32 %v4164_v14, 16  ;;  %v1850_v53 = vadd.f32 %v4480_v4, %v1620_v0  ;;  %v1829_v16 = vpop.f32.mrf.mxu0  ;;  %v2011_v14 = vld [vmem:[#allocation2 + $0x24] sm:$0x1]  ;;  %v2425_v0 = vld [vmem:[#allocation2 + $0x4c] sm:$0x1] }
 0x121   : > { %v1926_v8 = vrot.slane %v1924_v45, 7  ;;  %v1908_v35 = vshrl.u32 %v4162_v1, 16  ;;  %v4165_v12 = vpack.c.bf16 %v1870_v26, %v1870_v26  ;;  %v1911_v57 = vshll.u32 %v4162_v1, 16  ;;  %v1996_v45 = vld [vmem:[#allocation2 + $0x10] sm:$0xf] }
 0x122   : > { %v1868_v15 = vmax.f32 %v1860_v51, 0.0  ;;  %v1865_v32 = vadd.f32 %v5189_v38, %v1850_v53  ;;  %v1848_v36 = vadd.f32 %v1829_v16, %v1618_v54  ;;  %v4481_v2 = vpop.f32.mrf.mxu0  ;;  %v1999_v1 = vld [vmem:[#allocation2 + $0x14] sm:$0x1]  ;;  %v2534_v51 = vshll.u32 %v2425_v0, 16  ;;  %v2029_v53 = vld [vmem:[#allocation2 + $0x3c] sm:$0x1] }
 0x123   : > { %v1929_v20 = vor.u32 %v1927_v11, %v1926_v8  ;;  %v1930_v61 = vrot.slane %v1926_v8, 4  ;;  %v1910_v60 = vrot.slane %v1908_v35, 7  ;;  %v1932_v21 = vshrl.u32 %v4165_v12, 16 }
 0x124   : > { %v1935_v30 = vshll.u32 %v4165_v12, 16  ;;  %v4163_v31 = vpack.c.bf16 %v1868_v15, %v1868_v15  ;;  %v1873_v48 = vmax.f32 %v1865_v32, 0.0  ;;  %v1832_v50 = vpop.f32.mrf.mxu0  ;;  %v1863_v39 = vadd.f32 %v5189_v38, %v1848_v36  ;;  %v2026_v15 = vld [vmem:[#allocation2 + $0x38] sm:$0xf] }
 0x125   : > { %v2003_v19 = vsel %vm5229_vm14, %v1929_v20, %v2002_v10  ;;  %v2006_v33 = vsel %vm4973_vm7, %v1930_v61, %v2005_v13  ;;  %v1913_v34 = vor.u32 %v1911_v57, %v1910_v60  ;;  %v1914_v44 = vrot.slane %v1910_v60, 4 }
 0x126   : > { %2004 = vst [vmem:[#allocation2 + $0x18] sm:$0xf] %v2003_v19  ;;  %2007 = vst [vmem:[#allocation2 + $0x1c] sm:$0x1] %v2006_v33  ;;  %v1934_v42 = vrot.slane %v1932_v21, 7  ;;  %v1916_v47 = vshrl.u32 %v4163_v31, 16  ;;  %v1851_v27 = vadd.f32 %v4481_v2, %v1621_v7  ;;  %v4168_v49 = vpack.c.bf16 %v1873_v48, %v1873_v48 }
 0x127   : > { %v1919_v22 = vshll.u32 %v4163_v31, 16  ;;  %v1991_v52 = vsel %vm5229_vm14, %v1913_v34, %v1990_v24  ;;  %v1994_v23 = vsel %vm4973_vm7, %v1914_v44, %v1993_v28  ;;  %v1871_v26 = vmax.f32 %v1863_v39, 0.0  ;;  %v2014_v21 = vld [vmem:[#allocation2 + $0x28] sm:$0xf]  ;;  %v2017_v19 = vld [vmem:[#allocation2 + $0x2c] sm:$0x1] }
 0x128   : > { %1992 = vst [vmem:[#allocation2 + $0x8] sm:$0xf] %v1991_v52  ;;  %1995 = vst [vmem:[#allocation2 + $0xc] sm:$0x1] %v1994_v23  ;;  %v1937_v58 = vor.u32 %v1935_v30, %v1934_v42  ;;  %v1938_v59 = vrot.slane %v1934_v42, 4  ;;  %v1918_v62 = vrot.slane %v1916_v47, 7  ;;  %v1866_v41 = vadd.f32 %v5189_v38, %v1851_v27 }
 0x129   : > { %v1849_v3 = vadd.f32 %v1832_v50, %v1619_v17  ;;  %v1956_v11 = vshrl.u32 %v4168_v49, 16  ;;  %v4166_v35 = vpack.c.bf16 %v1871_v26, %v1871_v26  ;;  %v5251_v10 = vrot.slane %v2061_v5, 4 }
 0x12a   : > { %v2009_v54 = vsel %vm5229_vm14, %v1937_v58, %v2008_v25  ;;  %v2012_v4 = vsel %vm4973_vm7, %v1938_v59, %v2011_v14  ;;  %v1921_v7 = vor.u32 %v1919_v22, %v1918_v62  ;;  %v1922_v8 = vrot.slane %v1918_v62, 4  ;;  %v2032_v62 = vld [vmem:[#allocation2 + $0x40] sm:$0xf] }
 0x12b   : > { %2010 = vst [vmem:[#allocation2 + $0x20] sm:$0xf] %v2009_v54  ;;  %2013 = vst [vmem:[#allocation2 + $0x24] sm:$0x1] %v2012_v4  ;;  %v1874_v12 = vmax.f32 %v1866_v41, 0.0  ;;  %v1864_v16 = vadd.f32 %v5189_v38, %v1849_v3  ;;  %v2531_v17 = vor.u32 %v5224_v9, %v5222_v40  ;;  %v1958_v20 = vrot.slane %v1956_v11, 7 }
 0x12c   : > { %v1997_v13 = vsel %vm5229_vm14, %v1921_v7, %v1996_v45  ;;  %v2000_v57 = vsel %vm4973_vm7, %v1922_v8, %v1999_v1  ;;  %v1959_v61 = vshll.u32 %v4168_v49, 16  ;;  %v1940_v55 = vshrl.u32 %v4166_v35, 16  ;;  %v2035_v49 = vld [vmem:[#allocation2 + $0x44] sm:$0x1]  ;;  %v2020_v54 = vld [vmem:[#allocation2 + $0x30] sm:$0xf] }
 0x12d   : > { %1998 = vst [vmem:[#allocation2 + $0x10] sm:$0xf] %v1997_v13  ;;  %2001 = vst [vmem:[#allocation2 + $0x14] sm:$0x1] %v2000_v57  ;;  %v4169_v18 = vpack.c.bf16 %v1874_v12, %v1874_v12  ;;  %v5260_v5 = vld [vmem:[#allocation2 + $0x18] sm:$0xf] }
 0x12e   : > { %v1943_v60 = vshll.u32 %v4166_v35, 16  ;;  %v1872_v24 = vmax.f32 %v1864_v16, 0.0  ;;  %v2270_v28 = vshrl.u32 %v5260_v5, 16  ;;  %v5263_v30 = vrot.slane %v2534_v51, 5  ;;  %v2023_v4 = vld [vmem:[#allocation2 + $0x34] sm:$0x1] }
 0x12f   : > { %v1961_v31 = vor.u32 %v1959_v61, %v1958_v20  ;;  %v1962_v38 = vrot.slane %v1958_v20, 4  ;;  %v1942_v32 = vrot.slane %v1940_v55, 7  ;;  %v1964_v36 = vshrl.u32 %v4169_v18, 16  ;;  %v2225_v2 = vld [vmem:[#allocation2 + $0x8] sm:$0xf] }
 0x130   : > { %v1967_v33 = vshll.u32 %v4169_v18, 16  ;;  %v4167_v34 = vpack.c.bf16 %v1872_v24, %v1872_v24  ;;  %v2242_v44 = vshrl.u32 %v2225_v2, 16  ;;  %v2245_v42 = vshll.u32 %v2225_v2, 16  ;;  %v5269_v52 = vld [vmem:[#allocation2 + $0xc] sm:$0x1]  ;;  %v4602_v18 = vld [vmem:[%s5808_s6 + $0x1b8] sm:$0xff]  }
 0x131   : > { %v2027_v47 = vsel %vm5229_vm14, %v1961_v31, %v2026_v15  ;;  %v2030_v22 = vsel %vm4973_vm7, %v1962_v38, %v2029_v53  ;;  %v1945_v48 = vor.u32 %v1943_v60, %v1942_v32  ;;  %v1946_v50 = vrot.slane %v1942_v32, 4  ;;  %v2167_v23 = vld [vmem:[#allocation2 + $0x8] sm:$0xe]  ;;  %v4604_v38 = vld [vmem:[%s5808_s6 + $0x1f0] sm:$0xff]   ;;  %v5298_v32 = vld [vmem:[#allocation2 + $0x18] sm:$0xf] }
 0x132   : > { %2028 = vst [vmem:[#allocation2 + $0x38] sm:$0xf] %v2027_v47  ;;  %2031 = vst [vmem:[#allocation2 + $0x3c] sm:$0x1] %v2030_v22  ;;  %v1966_v25 = vrot.slane %v1964_v36, 7  ;;  %v1948_v14 = vshrl.u32 %v4167_v34, 16 }
 0x133   : > { %v1951_v39 = vshll.u32 %v4167_v34, 16  ;;  %v2244_v27 = vrot.slane %v2242_v44, 4  ;;  %v2015_v58 = vsel %vm5229_vm14, %v1945_v48, %v2014_v21  ;;  %v2018_v59 = vsel %vm4973_vm7, %v1946_v50, %v2017_v19  ;;  %v5280_v53 = vld [vmem:[#allocation2 + $0x20] sm:$0xf]  ;;  %v5288_v60 = vld [vmem:[#allocation2 + $0x8] sm:$0xf] }
 0x134   : > { %v2247_v0 = vrot.slane %v2245_v42, 5  ;;  %v4019_v45 = vrot.slane %v2167_v23, 9  ;;  %2016 = vst [vmem:[#allocation2 + $0x28] sm:$0xf] %v2015_v58  ;;  %2019 = vst [vmem:[#allocation2 + $0x2c] sm:$0x1] %v2018_v59  ;;  %v1969_v1 = vor.u32 %v1967_v33, %v1966_v25  ;;  %v4055_v9 = vcombine.low %v5260_v5, %v5280_v53 }
 0x135   : > { %v1970_v26 = vrot.slane %v1966_v25, 4  ;;  %v1950_v41 = vrot.slane %v1948_v14, 7  ;;  %v2226_v3 = vld [vmem:[#allocation2 + $0x10] sm:$0xf]  ;;  %v2199_v51 = vrot.slane %v5269_v52, 5  ;;  %v2273_v55 = vshll.u32 %v5260_v5, 16 }
 0x136   : > { %v2248_v7 = vor.u32 %v2247_v0, %v2244_v27  ;;  %v2256_v8 = vshrl.u32 %v2226_v3, 16  ;;  %v2259_v11 = vshll.u32 %v2226_v3, 16  ;;  %v4054_v35 = vcombine.low %v2225_v2, %v2226_v3  ;;  %v5312_v19 = vld [vmem:[#allocation2 + $0x10] sm:$0xf]  ;;  %v2049_v33 = vld [vmem:[#allocation2 + $0x1c] sm:$0x1] }
 0x137   : > { %v2033_v12 = vsel %vm5229_vm14, %v1969_v1, %v2032_v62  ;;  %v2036_v13 = vsel %vm4973_vm7, %v1970_v26, %v2035_v49  ;;  %v1953_v57 = vor.u32 %v1951_v39, %v1950_v41  ;;  %v1954_v15 = vrot.slane %v1950_v41, 4  ;;  %v4607_v44 = vld [vmem:[%s5808_s6 + $0x1b0] sm:$0xff]   ;;  %v4609_v25 = vld [vmem:[%s5808_s6 + $0x1e8] sm:$0xff]   ;;  %v2169_v58 = vld [vmem:[#allocation2 + $0x18] sm:$0xe] }
 0x138   : > { %2034 = vst [vmem:[#allocation2 + $0x40] sm:$0xf] %v2033_v12  ;;  %2037 = vst [vmem:[#allocation2 + $0x44] sm:$0x1] %v2036_v13  ;;  %v2258_v16 = vrot.slane %v2256_v8, 4  ;;  %v2261_v20 = vrot.slane %v2259_v11, 5  ;;  %3544 = vmatprep.mubr.bf16.mxu1 %v4054_v35  ;;  %v2200_v61 = vsel %vm5200_vm13, %v4019_v45, %v2199_v51 }
 0x139   : > { %v2021_v21 = vsel %vm5229_vm14, %v1953_v57, %v2020_v54  ;;  %v2024_v24 = vsel %vm4973_vm7, %v1954_v15, %v2023_v4  ;;  %v4050_v31 = vcombine.low %v5207_v63, %v2200_v61  ;;  %v5303_v36 = vrot.slane %v2531_v17, 4  ;;  %v2168_v22 = vld [vmem:[#allocation2 + $0x10] sm:$0xe]  ;;  %v4612_v51 = vld [vmem:[%s5808_s6 + $0x1a8] sm:$0xff]   ;;  %v4614_v11 = vld [vmem:[%s5808_s6 + $0x1e0] sm:$0xff]  }
 0x13a   : > { %2022 = vst [vmem:[#allocation2 + $0x30] sm:$0xf] %v2021_v21  ;;  %2025 = vst [vmem:[#allocation2 + $0x34] sm:$0x1] %v2024_v24  ;;  %v5305_v56 = vrot.slane %v2248_v7, 4  ;;  %v2262_v2 = vor.u32 %v2261_v20, %v2258_v16  ;;  %v2284_v6 = vshrl.u32 %v5280_v53, 16  ;;  %v2067_v63 = vsel %vm4791_vm4, %v5251_v10, %v5217_v37 }
 0x13b   : > { %3545 = vmatmul.mubr.bf16.vlgmr.msra.gmra.mxu1 %v4050_v31  ;;  %v5316_v40 = vrot.slane %v2270_v28, 4  ;;  %v2069_v17 = vshrl.u32 %v5288_v60, 16  ;;  %v2072_v34 = vshll.u32 %v5288_v60, 16  ;;  %v2048_v37 = vld [vmem:[#allocation2 + $0x14] sm:$0x1]  ;;  %v5327_v42 = vrot.slane %v2273_v55, 5 }
 0x13c   : > { %v5325_v10 = vrot.slane %v2262_v2, 4  ;;  %v2287_v47 = vshll.u32 %v5280_v53, 16  ;;  %4341 = vmatpush3.bf16.msra.mxu1 %v4602_v18  ;;  %v2078_v28 = vshll.u32 %v5269_v52, 16  ;;  %v5331_v5 = vrot.slane %v2284_v6, 4  ;;  %3552 = vmatprep.mubr.bf16.mxu1 %v4055_v9  ;;  %v2229_v45 = vld [vmem:[#allocation2 + $0x28] sm:$0xf] }
 0x13d   : > { %v2071_v48 = vrot.slane %v2069_v17, 4  ;;  %v2074_v50 = vrot.slane %v2072_v34, 5  ;;  %4342 = vmatprep.subr.bf16.mxu1 %v4604_v38  ;;  %v2083_v23 = vshrl.u32 %v5312_v19, 16  ;;  %v2086_v14 = vshll.u32 %v5312_v19, 16  ;;  %v4606_v18 = vld [vmem:[%s5808_s6 + $0x138] sm:$0xff]   ;;  %v4608_v38 = vld [vmem:[%s5808_s6 + $0x170] sm:$0xff]  }
 0x13e   : > { %v2092_v39 = vshll.u32 %v2048_v37, 16  ;;  %v2097_v27 = vshrl.u32 %v5298_v32, 16  ;;  %v2100_v52 = vshll.u32 %v5298_v32, 16  ;;  %v2106_v49 = vshll.u32 %v2049_v33, 16  ;;  %v5360_v2 = vld [vmem:[#allocation2 + $0x20] sm:$0xf] }
 0x13f   : > { %v2075_v59 = vor.u32 %v2074_v50, %v2071_v48  ;;  %v2085_v62 = vrot.slane %v2083_v23, 4  ;;  %v4020_v0 = vrot.slane %v2168_v22, 9  ;;  %v2080_v1 = vrot.slane %v2078_v28, 5  ;;  %v5367_v17 = vld [vmem:[#allocation2 + $0x28] sm:$0xf]  ;;  %v4611_v23 = vld [vmem:[%s5808_s6 + $0x130] sm:$0xff]  }
 0x140   : > { %4343 = vmatpush3.bf16.msra.mxu1 %v4607_v44  ;;  %v2088_v26 = vrot.slane %v2086_v14, 5  ;;  %v2099_v41 = vrot.slane %v2097_v27, 4  ;;  %v2102_v3 = vrot.slane %v2100_v52, 5  ;;  %v2094_v4 = vrot.slane %v2092_v39, 5  ;;  %v2050_v34 = vld [vmem:[#allocation2 + $0x24] sm:$0x1] }
 0x141   : > { %v2076_v54 = vrot.slane %v2075_v59, 4  ;;  %v2203_v7 = vrot.slane %v2048_v37, 5  ;;  %v4021_v8 = vrot.slane %v2169_v58, 9  ;;  %4344 = vmatprep.subr.bf16.mxu1 %v4609_v25  ;;  %v2207_v13 = vrot.slane %v2049_v33, 5  ;;  %v5346_v57 = vld [vmem:[#allocation2 + $0x30] sm:$0xf] }
 0x142   : > { %v2089_v35 = vor.u32 %v2088_v26, %v2085_v62  ;;  %v2103_v12 = vor.u32 %v2102_v3, %v2099_v41  ;;  %v2298_v15 = vshrl.u32 %v2229_v45, 16  ;;  %v2108_v16 = vrot.slane %v2106_v49, 5  ;;  %v2170_v22 = vld [vmem:[#allocation2 + $0x20] sm:$0xe]  ;;  %v4613_v25 = vld [vmem:[%s5808_s6 + $0x168] sm:$0xff]   ;;  %v4619_v27 = vld [vmem:[%s5808_s6 + $0x1d8] sm:$0xff]  }
 0x143   : > { %v2081_v53 = vsel %vm4791_vm4, %v2076_v54, %v2080_v1  ;;  %v2204_v20 = vsel %vm5200_vm13, %v4020_v0, %v2203_v7  ;;  %v2301_v61 = vshll.u32 %v2229_v45, 16  ;;  %v2208_v31 = vsel %vm5200_vm13, %v4021_v8, %v2207_v13  ;;  %v2171_v49 = vld [vmem:[#allocation2 + $0x28] sm:$0xe]  ;;  %v5395_v41 = vld [vmem:[#allocation2 + $0x38] sm:$0xf] }
 0x144   : > { %v4046_v55 = vcombine.low %v2067_v63, %v2081_v53  ;;  %v2090_v21 = vrot.slane %v2089_v35, 4  ;;  %v2104_v24 = vrot.slane %v2103_v12, 4  ;;  %4345 = vmatpush3.bf16.msra.mxu1 %v4612_v51  ;;  %v5362_v6 = vrot.slane %v2287_v47, 5  ;;  %v4622_v7 = vld [vmem:[%s5808_s6 + $0x198] sm:$0xff]   ;;  %v5404_v13 = vld [vmem:[#allocation2 + $0x40] sm:$0xf] }
 0x145   : > { %v4042_v63 = vcombine.low %v5171_v46, %v5288_v60  ;;  %v4051_v33 = vcombine.low %v2204_v20, %v2208_v31  ;;  %v2312_v9 = vshrl.u32 %v5346_v57, 16  ;;  %4346 = vmatprep.subr.bf16.mxu1 %v4614_v11  ;;  %v5373_v28 = vrot.slane %v2298_v15, 4  ;;  %v4617_v46 = vld [vmem:[%s5808_s6 + $0x1a0] sm:$0xff]   ;;  %v2051_v60 = vld [vmem:[#allocation2 + $0x2c] sm:$0x1] }
 0x146   : > { %3479 = vmatprep.mubr.bf16.mxu0 %v4046_v55  ;;  %v2095_v44 = vsel %vm4791_vm4, %v2090_v21, %v2094_v4  ;;  %v2109_v37 = vsel %vm4791_vm4, %v2104_v24, %v2108_v16  ;;  %v4056_v47 = vcombine.low %v2229_v45, %v5346_v57  ;;  %v5379_v50 = vrot.slane %v2301_v61, 5  ;;  %v4616_v53 = vld [vmem:[%s5808_s6 + $0x128] sm:$0xff]   ;;  %v4627_v61 = vld [vmem:[%s5808_s6 + $0x190] sm:$0xff]  }
 0x147   : > { %3480 = vmatmul.mubr.bf16.vlgmr.msra.gmra.mxu0 %v4042_v63  ;;  %v4047_v48 = vcombine.low %v2095_v44, %v2109_v37  ;;  %3553 = vmatmul.mubr.bf16.gmra.mxu1 %v4051_v33  ;;  %v2111_v14 = vshrl.u32 %v5360_v2, 16  ;;  %v2114_v39 = vshll.u32 %v5360_v2, 16  ;;  %v2315_v52 = vshll.u32 %v5346_v57, 16  ;;  %v4624_v57 = vld [vmem:[%s5808_s6 + $0x1d0] sm:$0xff]   ;;  %v4621_v44 = vld [vmem:[%s5808_s6 + $0x120] sm:$0xff]  }
 0x148   : > { %4301 = vmatpush3.bf16.msra.mxu0 %v4606_v18  ;;  %3560 = vmatprep.mubr.bf16.mxu1 %v4056_v47  ;;  %v2120_v58 = vshll.u32 %v2050_v34, 16  ;;  %v2125_v59 = vshrl.u32 %v5367_v17, 16  ;;  %v2128_v62 = vshll.u32 %v5367_v17, 16  ;;  %v2134_v1 = vshll.u32 %v2051_v60, 16  ;;  %v5425_v31 = vld [vmem:[#allocation2 + $0x30] sm:$0xf] }
 0x149   : > { %3487 = vmatprep.mubr.bf16.mxu0 %v4047_v48  ;;  %4302 = vmatprep.subr.bf16.mxu0 %v4608_v38  ;;  %v2113_v0 = vrot.slane %v2111_v14, 4  ;;  %v2116_v45 = vrot.slane %v2114_v39, 5  ;;  %v4022_v26 = vrot.slane %v2170_v22, 9  ;;  %v5397_v3 = vrot.slane %v2312_v9, 4  ;;  %v5427_v38 = vld [vmem:[#allocation2 + $0x38] sm:$0xf] }
 0x14a   : > { %4347 = vmatpush3.bf16.msra.mxu1 %v4617_v46  ;;  %v2127_v51 = vrot.slane %v2125_v59, 4  ;;  %v2130_v54 = vrot.slane %v2128_v62, 5  ;;  %v2211_v4 = vrot.slane %v2050_v34, 5  ;;  %v4043_v8 = vcombine.low %v5312_v19, %v5298_v32  ;;  %v4618_v32 = vld [vmem:[%s5808_s6 + $0x160] sm:$0xff]   ;;  %v2052_v37 = vld [vmem:[#allocation2 + $0x34] sm:$0x1] }
 0x14b   : > { %v2117_v11 = vor.u32 %v2116_v45, %v2113_v0  ;;  %v4023_v35 = vrot.slane %v2171_v49, 9  ;;  %v2215_v12 = vrot.slane %v2051_v60, 5  ;;  %4348 = vmatprep.subr.bf16.mxu1 %v4619_v27  ;;  %v5409_v15 = vrot.slane %v2315_v52, 5  ;;  %v4629_v47 = vld [vmem:[%s5808_s6 + $0x1c8] sm:$0xff]   ;;  %v4623_v39 = vld [vmem:[%s5808_s6 + $0x158] sm:$0xff]  }
 0x14c   : > { %4303 = vmatpush3.bf16.msra.mxu0 %v4611_v23  ;;  %v2122_v16 = vrot.slane %v2120_v58, 5  ;;  %v2131_v20 = vor.u32 %v2130_v54, %v2127_v51  ;;  %v2326_v19 = vshrl.u32 %v5395_v41, 16  ;;  %v2136_v18 = vrot.slane %v2134_v1, 5  ;;  %v2053_v23 = vld [vmem:[#allocation2 + $0x3c] sm:$0x1]  ;;  %v4631_v59 = vld [vmem:[%s5808_s6 + $0x188] sm:$0xff]  }
 0x14d   : > { %4304 = vmatprep.subr.bf16.mxu0 %v4613_v25  ;;  %v2118_v55 = vrot.slane %v2117_v11, 4  ;;  %v2212_v21 = vsel %vm5200_vm13, %v4022_v26, %v2211_v4  ;;  %v2216_v24 = vsel %vm5200_vm13, %v4023_v35, %v2215_v12  ;;  %v2329_v9 = vshll.u32 %v5395_v41, 16  ;;  %v2172_v25 = vld [vmem:[#allocation2 + $0x30] sm:$0xe]  ;;  %v2173_v26 = vld [vmem:[#allocation2 + $0x38] sm:$0xe] }
 0x14e   : > { %v2132_v63 = vrot.slane %v2131_v20, 4  ;;  %v4052_v33 = vcombine.low %v2212_v21, %v2216_v24  ;;  %v2340_v34 = vshrl.u32 %v5404_v13, 16  ;;  %4349 = vmatpush3.bf16.msra.mxu1 %v4622_v7  ;;  %v5439_v60 = vrot.slane %v2326_v19, 4  ;;  %v5456_v62 = vld [vmem:[#allocation2 + $0x10] sm:$0xf] }
 0x14f   : > { %3488 = vmatmul.mubr.bf16.gmra.mxu0 %v4043_v8  ;;  %v2123_v46 = vsel %vm4791_vm4, %v2118_v55, %v2122_v16  ;;  %v2343_v22 = vshll.u32 %v5404_v13, 16  ;;  %v4057_v48 = vcombine.low %v5395_v41, %v5404_v13  ;;  %4350 = vmatprep.subr.bf16.mxu1 %v4624_v57  ;;  %v4044_v27 = vcombine.low %v5360_v2, %v5367_v17  ;;  %v4633_v2 = vld [vmem:[%s5808_s6 + $0x1c0] sm:$0xff]   ;;  %v5463_v7 = vld [vmem:[#allocation2 + $0x18] sm:$0xf]  ;;  %v5465_v57 = vld [vmem:[#allocation2 + $0x14] sm:$0x1] }
 0x150   : > { %4305 = vmatpush3.bf16.msra.mxu0 %v4616_v53  ;;  %v2137_v14 = vsel %vm4791_vm4, %v2132_v63, %v2136_v18  ;;  %3561 = vmatmul.mubr.bf16.gmra.mxu1 %v4052_v33  ;;  %v2139_v52 = vshrl.u32 %v5425_v31, 16  ;;  %v2142_v58 = vshll.u32 %v5425_v31, 16  ;;  %v2148_v0 = vshll.u32 %v2052_v37, 16  ;;  %v4626_v53 = vld [vmem:[%s5808_s6 + $0x118] sm:$0xff]   ;;  %v4628_v18 = vld [vmem:[%s5808_s6 + $0x150] sm:$0xff]  }
 0x151   : > { %v4048_v49 = vcombine.low %v2123_v46, %v2137_v14  ;;  %4306 = vmatprep.subr.bf16.mxu0 %v4618_v32  ;;  %3568 = vmatprep.mubr.bf16.mxu1 %v4057_v48  ;;  %v2153_v45 = vshrl.u32 %v5427_v38, 16  ;;  %v2156_v1 = vshll.u32 %v5427_v38, 16  ;;  %v2162_v54 = vshll.u32 %v2053_v23, 16  ;;  %v5475_v21 = vld [vmem:[#allocation2 + $0x1c] sm:$0x1]  ;;  %v4636_v46 = vld [vmem:[%s5808_s6 + $0x180] sm:$0xff]  }
 0x152   : > { %4351 = vmatpush3.bf16.msra.mxu1 %v4627_v61  ;;  %v2141_v17 = vrot.slane %v2139_v52, 4  ;;  %v2144_v51 = vrot.slane %v2142_v58, 5  ;;  %v4024_v4 = vrot.slane %v2172_v25, 9  ;;  %v2150_v8 = vrot.slane %v2148_v0, 5  ;;  %v5486_v48 = vld [vmem:[#allocation2 + $0xc] sm:$0x1] }
 0x153   : > { %3495 = vmatprep.mubr.bf16.mxu0 %v4048_v49  ;;  %v2155_v11 = vrot.slane %v2153_v45, 4  ;;  %v2158_v35 = vrot.slane %v2156_v1, 5  ;;  %v2219_v12 = vrot.slane %v2052_v37, 5  ;;  %4352 = vmatprep.subr.bf16.mxu1 %v4629_v47  ;;  %v2164_v20 = vrot.slane %v2162_v54, 5  ;;  %v4630_v14 = vld [vmem:[%s5808_s6 + $0x110] sm:$0xff]   ;;  %v4632_v45 = vld [vmem:[%s5808_s6 + $0x148] sm:$0xff]  }
 0x154   : > { %4307 = vmatpush3.bf16.msra.mxu0 %v4621_v44  ;;  %v2145_v16 = vor.u32 %v2144_v51, %v2141_v17  ;;  %v4025_v32 = vrot.slane %v2173_v26, 9  ;;  %v2223_v19 = vrot.slane %v2053_v23, 5  ;;  %v2427_v24 = vshrl.u32 %v5456_v62, 16  ;;  %v2234_v58 = vld [vmem:[#allocation2 + $0x14] sm:$0x1] }
 0x155   : > { %4308 = vmatprep.subr.bf16.mxu0 %v4623_v39  ;;  %v2159_v61 = vor.u32 %v2158_v35, %v2155_v11  ;;  %v2220_v55 = vsel %vm5200_vm13, %v4024_v4, %v2219_v12  ;;  %v2430_v63 = vshll.u32 %v5456_v62, 16  ;;  %v2436_v37 = vshll.u32 %v5465_v57, 16  ;;  %v2353_v1 = vld [vmem:[#allocation2 + $0x8] sm:$0xe]  ;;  %v2354_v17 = vld [vmem:[#allocation2 + $0x10] sm:$0xe] }
 0x156   : > { %v2146_v33 = vrot.slane %v2145_v16, 4  ;;  %v2224_v44 = vsel %vm5200_vm13, %v4025_v32, %v2223_v19  ;;  %4353 = vmatpush3.bf16.msra.mxu1 %v4631_v59  ;;  %v2441_v47 = vshrl.u32 %v5463_v7, 16  ;;  %v2429_v39 = vrot.slane %v2427_v24, 4  ;;  %v5508_v51 = vld [vmem:[#allocation2 + $0x20] sm:$0xf] }
 0x157   : > { %3496 = vmatmul.mubr.bf16.gmra.mxu0 %v4044_v27  ;;  %v2160_v23 = vrot.slane %v2159_v61, 4  ;;  %v4053_v25 = vcombine.low %v2220_v55, %v2224_v44  ;;  %v2432_v52 = vrot.slane %v2430_v63, 5  ;;  %4354 = vmatprep.subr.bf16.mxu1 %v4633_v2  ;;  %v5493_v59 = vrot.slane %v2329_v9, 5  ;;  %v5525_v55 = vld [vmem:[#allocation2 + $0x2c] sm:$0x1]  ;;  %v4637_v63 = vld [vmem:[%s5808_s6 + $0x140] sm:$0xff]  }
 0x158   : > { %4309 = vmatpush3.bf16.msra.mxu0 %v4626_v53  ;;  %v2151_v49 = vsel %vm4791_vm4, %v2146_v33, %v2150_v8  ;;  %v2443_v0 = vrot.slane %v2441_v47, 4  ;;  %v2444_v27 = vshll.u32 %v5463_v7, 16  ;;  %v5503_v26 = vrot.slane %v2340_v34, 4  ;;  %v5514_v34 = vld [vmem:[#allocation2 + $0x28] sm:$0xf] }
 0x159   : > { %v2165_v41 = vsel %vm4791_vm4, %v2160_v23, %v2164_v20  ;;  %3569 = vmatmul.mubr.bf16.gmra.mxu1 %v4053_v25  ;;  %4310 = vmatprep.subr.bf16.mxu0 %v4628_v18  ;;  %v2433_v9 = vor.u32 %v2432_v52, %v2429_v39  ;;  %v2450_v2 = vshll.u32 %v5475_v21, 16  ;;  %v5512_v54 = vrot.slane %v2343_v22, 5  ;;  %v5519_v20 = vld [vmem:[#allocation2 + $0x24] sm:$0x1]  ;;  %v4635_v22 = vld [vmem:[%s5808_s6 + $0x108] sm:$0xff]  }
 0x15a   : > { %v4049_v4 = vcombine.low %v2151_v49, %v2165_v41  ;;  %v2438_v8 = vrot.slane %v2436_v37, 5  ;;  %v2446_v11 = vrot.slane %v2444_v27, 5  ;;  %4355 = vmatpush3.bf16.msra.mxu1 %v4636_v46  ;;  %v4045_v12 = vcombine.low %v5425_v31, %v5427_v38  ;;  %v2355_v27 = vld [vmem:[#allocation2 + $0x18] sm:$0xe] }
 0x15b   : > { %v2434_v35 = vrot.slane %v2433_v9, 4  ;;  %v4026_v53 = vrot.slane %v2353_v1, 9  ;;  %v2379_v16 = vrot.slane %v5486_v48, 5  ;;  %v2251_v32 = vshll.u32 %v5486_v48, 16  ;;  %v4639_v48 = vld [vmem:[%s5808_s6 + $0x100] sm:$0xff]  }
 0x15c   : > { %3503 = vmatprep.mubr.bf16.mxu0 %v4049_v4  ;;  %4311 = vmatpush3.bf16.msra.mxu0 %v4630_v14  ;;  %v2447_v13 = vor.u32 %v2446_v11, %v2443_v0  ;;  %v2265_v19 = vshll.u32 %v2234_v58, 16  ;;  %v4027_v61 = vrot.slane %v2354_v17, 9  ;;  %v2452_v38 = vrot.slane %v2450_v2, 5  ;;  %v5547_v0 = vld [vmem:[#allocation2 + $0x1c] sm:$0x1] }
 0x15d   : > { %v2439_v31 = vsel %vm4791_vm4, %v2434_v35, %v2438_v8  ;;  %4312 = vmatprep.subr.bf16.mxu0 %v4632_v45  ;;  %v2380_v18 = vsel %vm5200_vm13, %v4026_v53, %v2379_v16  ;;  %v2383_v24 = vrot.slane %v2234_v58, 5  ;;  %v2455_v44 = vshrl.u32 %v5508_v51, 16  ;;  %v4640_v2 = vld [vmem:[%s5808_s6 + $0x238] sm:$0xff]   ;;  %v2356_v17 = vld [vmem:[#allocation2 + $0x20] sm:$0xe] }
 0x15e   : > { %v2448_v33 = vrot.slane %v2447_v13, 4  ;;  %v2458_v37 = vshll.u32 %v5508_v51, 16  ;;  %v2464_v47 = vshll.u32 %v5519_v20, 16  ;;  %v2469_v23 = vshrl.u32 %v5514_v34, 16  ;;  %v5554_v53 = vld [vmem:[#allocation2 + $0x30] sm:$0xf] }
 0x15f   : > { %3504 = vmatmul.mubr.bf16.gmra.mxu0 %v4045_v12  ;;  %v2384_v46 = vsel %vm5200_vm13, %v4027_v61, %v2383_v24  ;;  %v2472_v25 = vshll.u32 %v5514_v34, 16  ;;  %v2478_v14 = vshll.u32 %v5525_v55, 16  ;;  %v2457_v58 = vrot.slane %v2455_v44, 4  ;;  %v2236_v12 = vld [vmem:[#allocation2 + $0x24] sm:$0x1] }
 0x160   : > { %v2453_v39 = vsel %vm4791_vm4, %v2448_v33, %v2452_v38  ;;  %4313 = vmatpush3.bf16.msra.mxu0 %v4635_v22  ;;  %v4062_v52 = vcombine.low %v2380_v18, %v2384_v46  ;;  %v2460_v49 = vrot.slane %v2458_v37, 5  ;;  %v2267_v1 = vrot.slane %v2265_v19, 5  ;;  %v5559_v61 = vld [vmem:[#allocation2 + $0x34] sm:$0x1]  ;;  %v5565_v38 = vld [vmem:[#allocation2 + $0x38] sm:$0xf] }
 0x161   : > { %v4070_v45 = vcombine.low %v2439_v31, %v2453_v39  ;;  %4314 = vmatprep.subr.bf16.mxu0 %v4637_v63  ;;  %v2471_v41 = vrot.slane %v2469_v23, 4  ;;  %v2474_v9 = vrot.slane %v2472_v25, 5  ;;  %v2253_v4 = vrot.slane %v2251_v32, 5  ;;  %v5575_v37 = vld [vmem:[#allocation2 + $0x3c] sm:$0x1] }
 0x162   : > { %3609 = vmatprep.mubr.bf16.mxu0 %v4062_v52  ;;  %v4066_v8 = vcombine.low %v5456_v62, %v5463_v7  ;;  %v2461_v11 = vor.u32 %v2460_v49, %v2457_v58  ;;  %v2466_v35 = vrot.slane %v2464_v47, 5  ;;  %v2480_v13 = vrot.slane %v2478_v14, 5 }
 0x163   : > { %3674 = vmatprep.mubr.bf16.mxu1 %v4070_v45  ;;  %v2475_v16 = vor.u32 %v2474_v9, %v2471_v41  ;;  %v2268_v22 = vsel %vm4791_vm4, %v5325_v10, %v2267_v1  ;;  %v4028_v19 = vrot.slane %v2355_v27, 9  ;;  %v2254_v62 = vsel %vm4791_vm4, %v5305_v56, %v2253_v4  ;;  %v4642_v10 = vld [vmem:[%s5808_s6 + $0x230] sm:$0xff]   ;;  %v2357_v27 = vld [vmem:[#allocation2 + $0x28] sm:$0xe] }
 0x164   : > { %3675 = vmatmul.mubr.bf16.vlgmr.msra.gmra.mxu1 %v4066_v8  ;;  %4315 = vmatpush3.bf16.msra.mxu0 %v4639_v48  ;;  %v2462_v32 = vrot.slane %v2461_v11, 4  ;;  %v2387_v7 = vrot.slane %v5547_v0, 5  ;;  %v4029_v31 = vrot.slane %v2356_v17, 9  ;;  %v4058_v24 = vcombine.low %v2254_v62, %v2268_v22  ;;  %v4643_v9 = vld [vmem:[%s5808_s6 + $0x228] sm:$0xff]   ;;  %v2238_v11 = vld [vmem:[#allocation2 + $0x34] sm:$0x1] }
 0x165   : > { %v2476_v18 = vrot.slane %v2475_v16, 4  ;;  %4492 = vmatprep.subr.bf16.mxu0 %v4640_v2  ;;  %v2391_v63 = vrot.slane %v2236_v12, 5  ;;  %v2483_v33 = vshrl.u32 %v5554_v53, 16  ;;  %v2486_v47 = vshll.u32 %v5554_v53, 16 }
 0x166   : > { %v2467_v44 = vsel %vm4791_vm4, %v2462_v32, %v2466_v35  ;;  %v2388_v56 = vsel %vm5200_vm13, %v4028_v19, %v2387_v7  ;;  %v2492_v46 = vshll.u32 %v5559_v61, 16  ;;  %v2497_v14 = vshrl.u32 %v5565_v38, 16  ;;  %v2358_v35 = vld [vmem:[#allocation2 + $0x30] sm:$0xe] }
 0x167   : > { %v2481_v48 = vsel %vm4791_vm4, %v2476_v18, %v2480_v13  ;;  %3610 = vmatmul.mubr.bf16.vlgmr.msra.gmra.mxu0 %v4058_v24  ;;  %v2392_v23 = vsel %vm5200_vm13, %v4029_v31, %v2391_v63  ;;  %v2485_v25 = vrot.slane %v2483_v33, 4  ;;  %v4067_v58 = vcombine.low %v5508_v51, %v5514_v34 }
 0x168   : > { %v4071_v39 = vcombine.low %v2467_v44, %v2481_v48  ;;  %4493 = vmatpush3.bf16.msra.mxu0 %v4640_v2  ;;  %v4063_v52 = vcombine.low %v2388_v56, %v2392_v23  ;;  %v2488_v49 = vrot.slane %v2486_v47, 5  ;;  %v2499_v45 = vrot.slane %v2497_v14, 4  ;;  %v2237_v2 = vld [vmem:[#allocation2 + $0x2c] sm:$0x1] }
 0x169   : > { %4494 = vmatprep.subr.bf16.mxu0 %v4642_v10  ;;  %v2500_v1 = vshll.u32 %v5565_v38, 16  ;;  %v2506_v41 = vshll.u32 %v5575_v37, 16  ;;  %v2276_v17 = vor.u32 %v5327_v42, %v5316_v40  ;;  %v2279_v51 = vshll.u32 %v5547_v0, 16 }
 0x16a   : > { %3682 = vmatprep.mubr.bf16.mxu1 %v4071_v39  ;;  %3617 = vmatprep.mubr.bf16.mxu0 %v4063_v52  ;;  %v2489_v4 = vor.u32 %v2488_v49, %v2485_v25  ;;  %v2290_v34 = vor.u32 %v5362_v6, %v5331_v5  ;;  %v2293_v8 = vshll.u32 %v2236_v12, 16  ;;  %v2494_v16 = vrot.slane %v2492_v46, 5  ;;  %v4645_v5 = vld [vmem:[%s5808_s6 + $0x220] sm:$0xff]   ;;  %v5617_v39 = vld [vmem:[#allocation2 + $0x3c] sm:$0x1] }
 0x16b   : > { %v2502_v13 = vrot.slane %v2500_v1, 5  ;;  %v2277_v22 = vrot.slane %v2276_v17, 4  ;;  %v4030_v19 = vrot.slane %v2357_v27, 9  ;;  %v2281_v40 = vrot.slane %v2279_v51, 5  ;;  %v5599_v6 = vld [vmem:[#allocation2 + $0x40] sm:$0xf] }
 0x16c   : > { %3683 = vmatmul.mubr.bf16.gmra.mxu1 %v4067_v58  ;;  %v2490_v32 = vrot.slane %v2489_v4, 4  ;;  %4495 = vmatpush3.bf16.msra.mxu0 %v4642_v10  ;;  %v2291_v42 = vrot.slane %v2290_v34, 4  ;;  %v2295_v62 = vrot.slane %v2293_v8, 5  ;;  %v2395_v31 = vrot.slane %v2237_v2, 5  ;;  %v5611_v46 = vld [vmem:[#allocation2 + $0x44] sm:$0x1] }
 0x16d   : > { %v2503_v7 = vor.u32 %v2502_v13, %v2499_v45  ;;  %4496 = vmatprep.subr.bf16.mxu0 %v4643_v9  ;;  %v4031_v0 = vrot.slane %v2358_v35, 9  ;;  %v2399_v18 = vrot.slane %v2238_v11, 5  ;;  %v2508_v24 = vrot.slane %v2506_v41, 5  ;;  %v4646_v58 = vld [vmem:[%s5808_s6 + $0x218] sm:$0xff]   ;;  %v2360_v45 = vld [vmem:[#allocation2 + $0x40] sm:$0xe] }
 0x16e   : > { %v2495_v12 = vsel %vm4791_vm4, %v2490_v32, %v2494_v16  ;;  %v2282_v63 = vsel %vm4791_vm4, %v2277_v22, %v2281_v40  ;;  %v2296_v10 = vsel %vm4791_vm4, %v2291_v42, %v2295_v62  ;;  %v2396_v56 = vsel %vm5200_vm13, %v4030_v19, %v2395_v31  ;;  %v2240_v4 = vld [vmem:[#allocation2 + $0x44] sm:$0x1] }
 0x16f   : > { %v2504_v33 = vrot.slane %v2503_v7, 4  ;;  %v4059_v44 = vcombine.low %v2282_v63, %v2296_v10  ;;  %v2400_v47 = vsel %vm5200_vm13, %v4031_v0, %v2399_v18  ;;  %v4068_v23 = vcombine.low %v5554_v53, %v5565_v38  ;;  %v2359_v38 = vld [vmem:[#allocation2 + $0x38] sm:$0xe]  ;;  %v2538_v7 = vld [vmem:[#allocation2 + $0x10] sm:$0xe] }
 0x170   : > { %4497 = vmatpush3.bf16.msra.mxu0 %v4643_v9  ;;  %v4064_v48 = vcombine.low %v2396_v56, %v2400_v47  ;;  %v2511_v25 = vshrl.u32 %v5599_v6, 16  ;;  %v2514_v14 = vshll.u32 %v5599_v6, 16  ;;  %v2304_v49 = vor.u32 %v5379_v50, %v5373_v28  ;;  %v4651_v10 = vld [vmem:[#allocation2 + $0x48] sm:$0xf] }
 0x171   : > { %v2509_v52 = vsel %vm4791_vm4, %v2504_v33, %v2508_v24  ;;  %3618 = vmatmul.mubr.bf16.gmra.mxu0 %v4059_v44  ;;  %4498 = vmatprep.subr.bf16.mxu0 %v4645_v5  ;;  %v2307_v27 = vshll.u32 %v2237_v2, 16  ;;  %v2318_v53 = vor.u32 %v5409_v15, %v5397_v3  ;;  %v2520_v17 = vshll.u32 %v5611_v46, 16 }
 0x172   : > { %v4072_v1 = vcombine.low %v2495_v12, %v2509_v52  ;;  %3625 = vmatprep.mubr.bf16.mxu0 %v4064_v48  ;;  %v2513_v41 = vrot.slane %v2511_v25, 4  ;;  %v2516_v9 = vrot.slane %v2514_v14, 5  ;;  %v2305_v51 = vrot.slane %v2304_v49, 4  ;;  %v2542_v52 = vld [vmem:[#allocation2 + $0x30] sm:$0xe] }
 0x173   : > { %v2309_v34 = vrot.slane %v2307_v27, 5  ;;  %v2319_v8 = vrot.slane %v2318_v53, 4  ;;  %v2321_v35 = vshll.u32 %v2238_v11, 16  ;;  %v4032_v28 = vrot.slane %v2359_v38, 9  ;;  %v4648_v11 = vld [vmem:[%s5808_s6 + $0x210] sm:$0xff]  }
 0x174   : > { %3690 = vmatprep.mubr.bf16.mxu1 %v4072_v1  ;;  %v2517_v16 = vor.u32 %v2516_v9, %v2513_v41  ;;  %4499 = vmatpush3.bf16.msra.mxu0 %v4645_v5  ;;  %v2403_v50 = vrot.slane %v5617_v39, 5  ;;  %v4033_v3 = vrot.slane %v2360_v45, 9  ;;  %v2537_v15 = vsel %vm4791_vm4, %v5303_v36, %v5263_v30  ;;  %v4649_v5 = vld [vmem:[%s5808_s6 + $0x208] sm:$0xff]   ;;  %v2540_v49 = vld [vmem:[#allocation2 + $0x20] sm:$0xe] }
 0x175   : > { %3691 = vmatmul.mubr.bf16.gmra.mxu1 %v4068_v23  ;;  %4500 = vmatprep.subr.bf16.mxu0 %v4646_v58  ;;  %v2323_v2 = vrot.slane %v2321_v35, 5  ;;  %v2407_v13 = vrot.slane %v2240_v4, 5  ;;  %v2522_v19 = vrot.slane %v2520_v17, 5  ;;  %v2310_v32 = vsel %vm4791_vm4, %v2305_v51, %v2309_v34  ;;  %v2543_v45 = vld [vmem:[#allocation2 + $0x38] sm:$0xe] }
 0x176   : > { %v2518_v22 = vrot.slane %v2517_v16, 4  ;;  %v2332_v40 = vor.u32 %v5493_v59, %v5439_v60  ;;  %v2346_v36 = vor.u32 %v5512_v54, %v5503_v26  ;;  %v2349_v62 = vshll.u32 %v2240_v4, 16  ;;  %v2539_v54 = vld [vmem:[#allocation2 + $0x18] sm:$0xe] }
 0x177   : > { %v2324_v42 = vsel %vm4791_vm4, %v2319_v8, %v2323_v2  ;;  %v2408_v30 = vsel %vm5200_vm13, %v4033_v3, %v2407_v13  ;;  %v2404_v18 = vsel %vm5200_vm13, %v4032_v28, %v2403_v50  ;;  %v2335_v12 = vshll.u32 %v5617_v39, 16  ;;  %v2544_v8 = vld [vmem:[#allocation2 + $0x40] sm:$0xe]  ;;  %v4652_v3 = vld [vmem:[#allocation2 + $0x4c] sm:$0x1] }
 0x178   : > { %v2523_v31 = vsel %vm4791_vm4, %v2518_v22, %v2522_v19  ;;  %v4060_v0 = vcombine.low %v2310_v32, %v2324_v42  ;;  %4501 = vmatpush3.bf16.msra.mxu0 %v4646_v58  ;;  %v4065_v59 = vcombine.low %v2404_v18, %v2408_v30  ;;  %v2347_v26 = vrot.slane %v2346_v36, 4  ;;  %v5686_v22 = vpop.f32.mrf.mxu1 }
 0x179   : > { %v4073_v60 = vcombine.low %v2523_v31, %v2537_v15  ;;  %4502 = vmatprep.subr.bf16.mxu0 %v4648_v11  ;;  %v4034_v24 = vrot.slane %v2538_v7, 9  ;;  %v2564_v63 = vrot.slane %v5465_v57, 5  ;;  %v4069_v33 = vcombine.low %v5599_v6, %v4651_v10  ;;  %v4650_v57 = vld [vmem:[%s5808_s6 + $0x200] sm:$0xff]   ;;  %v2541_v6 = vld [vmem:[#allocation2 + $0x28] sm:$0xe] }
 0x17a   : > { %3626 = vmatmul.mubr.bf16.gmra.mxu0 %v4060_v0  ;;  %v2333_v44 = vrot.slane %v2332_v40, 4  ;;  %v2351_v56 = vrot.slane %v2349_v62, 5  ;;  %v4035_v47 = vrot.slane %v2539_v54, 9  ;;  %v2568_v48 = vrot.slane %v5475_v21, 5  ;;  %v5688_v19 = vpop.f32.mrf.mxu1 }
 0x17b   : > { %3698 = vmatprep.mubr.bf16.mxu1 %v4073_v60  ;;  %3633 = vmatprep.mubr.bf16.mxu0 %v4065_v59  ;;  %v2337_v23 = vrot.slane %v2335_v12, 5  ;;  %v2565_v14 = vsel %vm5200_vm13, %v4034_v24, %v2564_v63  ;;  %v2576_v27 = vrot.slane %v5525_v55, 5  ;;  %v4037_v38 = vrot.slane %v2541_v6, 9  ;;  %v2545_v55 = vld [vmem:[#allocation2 + $0x48] sm:$0xe] }
 0x17c   : > { %4503 = vmatpush3.bf16.msra.mxu0 %v4648_v11  ;;  %v2352_v25 = vsel %vm4791_vm4, %v2347_v26, %v2351_v56  ;;  %v2569_v21 = vsel %vm5200_vm13, %v4035_v47, %v2568_v48  ;;  %v4038_v1 = vrot.slane %v2542_v52, 9  ;;  %v2580_v41 = vrot.slane %v5559_v61, 5  ;;  %v5690_v32 = vpop.f32.mrf.mxu1 }
 0x17d   : > { %3699 = vmatmul.mubr.bf16.gmra.mxu1 %v4069_v33  ;;  %4504 = vmatprep.subr.bf16.mxu0 %v4649_v5  ;;  %v2338_v39 = vsel %vm4791_vm4, %v2333_v44, %v2337_v23  ;;  %v4074_v53 = vcombine.low %v2565_v14, %v2569_v21  ;;  %v2572_v43 = vrot.slane %v5519_v20, 5  ;;  %v4036_v9 = vrot.slane %v2540_v49, 9 }
 0x17e   : > { %v4061_v58 = vcombine.low %v2338_v39, %v2352_v25  ;;  %v4039_v17 = vrot.slane %v2543_v45, 9  ;;  %v2584_v4 = vrot.slane %v5575_v37, 5  ;;  %v2577_v51 = vsel %vm5200_vm13, %v4037_v38, %v2576_v27  ;;  %v5692_v40 = vpop.f32.mrf.mxu1 }
 0x17f   : > { %v2581_v34 = vsel %vm5200_vm13, %v4038_v1, %v2580_v41  ;;  %v2573_v35 = vsel %vm5200_vm13, %v4036_v9, %v2572_v43  ;;  %v4041_v16 = vrot.slane %v2545_v55, 9  ;;  %v4040_v50 = vrot.slane %v2544_v8, 9 }
 0x180   : > { %4505 = vmatpush3.bf16.msra.mxu0 %v4649_v5  ;;  %v4075_v61 = vcombine.low %v2573_v35, %v2577_v51  ;;  %v2585_v20 = vsel %vm5200_vm13, %v4039_v17, %v2584_v4  ;;  %v2588_v37 = vrot.slane %v5611_v46, 5  ;;  %v2592_v15 = vrot.slane %v4652_v3, 5  ;;  %v5694_v46 = vpop.f32.mrf.mxu1 }
 0x181   : > { %4506 = vmatprep.subr.bf16.mxu0 %v4650_v57  ;;  %v4076_v28 = vcombine.low %v2581_v34, %v2585_v20 }
 0x182   : > { %3634 = vmatmul.mubr.bf16.gmra.mxu0 %v4061_v58  ;;  %v2589_v2 = vsel %vm5200_vm13, %v4040_v50, %v2588_v37  ;;  %v2593_v13 = vsel %vm5200_vm13, %v4041_v16, %v2592_v15  ;;  %v5696_v42 = vpop.f32.mrf.mxu1 }
 0x183   : > { %4508 = vmatprep.mubr.bf16.mxu0 %v4074_v53  ;;  %v4077_v11 = vcombine.low %v2589_v2, %v2593_v13 }
 0x184   : > { %4507 = vmatpush3.bf16.msra.mxu0 %v4650_v57  ;;  %v5698_v30 = vpop.f32.mrf.mxu1 }
 0x186   : > { %v5700_v36 = vpop.f32.mrf.mxu1 }
 0x18a   : > { %4509 = vmatmul.mubr.bf16.vlgmr.msra.gmra.mxu0 %v4075_v61 }
 0x18b   : > { %4512 = vmatprep.mubr.bf16.mxu0 %v4076_v28 }
 0x192   : > { %4513 = vmatmul.mubr.bf16.gmra.mxu0 %v4077_v11 }
 0x1fb   : > { %v5702_v29 = vpop.f32.mrf.mxu1 }
 0x1fd   : > { %v5704_v62 = vpop.f32.mrf.mxu1 }
 0x1ff   : > { %v5706_v7 = vpop.f32.mrf.mxu1 }
 0x201   : > { %v5708_v31 = vpop.f32.mrf.mxu1 }
 0x207   : > { %v4236_v0 = vpop.f32.mrf.mxu0  ;;  %v4282_v18 = vpop.f32.mrf.mxu1 }
 0x209   : > { %v4237_v60 = vpop.f32.mrf.mxu0  ;;  %v4283_v59 = vpop.f32.mrf.mxu1 }
 0x20a   : > { %v4238_v13 = vadd.f32 %v4237_v60, %v4236_v0 }
 0x20b   : > { %v4239_v5 = vpop.f32.mrf.mxu0  ;;  %v5710_v12 = vpop.f32.mrf.mxu1 }
 0x20d   : > { %v4240_v26 = vpop.f32.mrf.mxu0  ;;  %v4286_v54 = vpop.f32.mrf.mxu1 }
 0x20f   : > { %v4242_v24 = vpop.f32.mrf.mxu0 }
 0x210   : > { %v5712_v63 = vpop.f32.mrf.mxu1 }
 0x211   : > { %v4243_v10 = vpop.f32.mrf.mxu0 }
 0x212   : > { %v5714_v33 = vpop.f32.mrf.mxu1  ;;  %v4244_v3 = vadd.f32 %v4243_v10, %v4242_v24  ;;  %v4278_v24 = vadd.f32 %v5704_v62, %v5702_v29 }
 0x213   : > { %v4245_v44 = vpop.f32.mrf.mxu0 }
 0x214   : > { %v5716_v56 = vpop.f32.mrf.mxu1 }
 0x215   : > { %5822 = vst [vmem:[#allocation3_spill] sm:$0xff] %v5716_v56  ;;  %v4246_v47 = vpop.f32.mrf.mxu0  ;;  %v3490_v56 = vadd.f32 %v5686_v22, %v4244_v3 }
 0x216   : > { %v5718_v48 = vpop.f32.mrf.mxu1  ;;  %v4247_v11 = vadd.f32 %v4246_v47, %v4245_v44 }
 0x217   : > { %5823 = vst [vmem:[#allocation4_spill] sm:$0xff] %v5718_v48  ;;  %v4248_v23 = vpop.f32.mrf.mxu0 }
 0x218   : > { %v3493_v10 = vadd.f32 %v5690_v32, %v4247_v11 }
 0x219   : > { %v4249_v25 = vpop.f32.mrf.mxu0  ;;  %v5720_v57 = vpop.f32.mrf.mxu1 }
 0x21a   : > { %v4250_v60 = vadd.f32 %v4249_v25, %v4248_v23 }
 0x21b   : > { %v5722_v14 = vpop.f32.mrf.mxu0  ;;  %v5724_v6 = vpop.f32.mrf.mxu1 }
 0x21c   : > { %v3498_v25 = vadd.f32 %v4250_v60, %v5696_v42 }
 0x21d   : > { %v5726_v39 = vpop.f32.mrf.mxu0  ;;  %v5728_v52 = vpop.f32.mrf.mxu1 }
 0x21e   : > { %5824 = vst [vmem:[#allocation5_spill] sm:$0xff] %v5728_v52  ;;  %v4284_v52 = vadd.f32 %v4283_v59, %v4282_v18  ;;  %v4281_v59 = vadd.f32 %v5708_v31, %v5706_v7 }
 0x21f   : > { %v4254_v58 = vpop.f32.mrf.mxu0  ;;  %v5730_v21 = vpop.f32.mrf.mxu1 }
 0x220   : > { %5825 = vst [vmem:[#allocation6_spill] sm:$0xff] %v5730_v21 }
 0x221   : > { %v4255_v49 = vpop.f32.mrf.mxu0 }
 0x222   : > { %v4256_v44 = vadd.f32 %v4255_v49, %v4254_v58 }
 0x223   : > { %v4257_v27 = vpop.f32.mrf.mxu0 }
 0x224   : > { %v5732_v53 = vpop.f32.mrf.mxu1 }
 0x225   : > { %v4258_v38 = vpop.f32.mrf.mxu0 }
 0x226   : > { %v4357_v45 = vpop.f32.mrf.mxu1  ;;  %v4259_v29 = vadd.f32 %v4258_v38, %v4257_v27  ;;  %v4296_v27 = vadd.f32 %v5724_v6, %v5720_v57  ;;  %v5832_v6 = vld [vmem:[#allocation5_spill] sm:$0xff] }
 0x227   : > { %v4316_v1 = vpop.f32.mrf.mxu0  ;;  %v4358_v38 = vadd.f32 %v4357_v45, %v5732_v53  ;;  %v5833_v53 = vld [vmem:[#allocation6_spill] sm:$0xff] }
 0x228   : > { %v5734_v41 = vpop.f32.mrf.mxu1  ;;  %v4299_v45 = vadd.f32 %v5833_v53, %v5832_v6 }
 0x229   : > { %5826 = vst [vmem:[#allocation7_spill] sm:$0xff] %v5734_v41  ;;  %v4317_v43 = vpop.f32.mrf.mxu0 }
 0x22a   : > { %v5736_v9 = vpop.f32.mrf.mxu1  ;;  %v4318_v47 = vadd.f32 %v4317_v43, %v4316_v1  ;;  %v3509_v1 = vadd.f32 %v5698_v30, %v4259_v29 }
 0x22b   : > { %5827 = vst [vmem:[#allocation8_spill] sm:$0xff] %v5736_v9  ;;  %v4319_v17 = vpop.f32.mrf.mxu0  ;;  %v4241_v9 = vadd.f32 %v4240_v26, %v4239_v5  ;;  %v4287_v5 = vadd.f32 %v4286_v54, %v5710_v12  ;;  %v4290_v12 = vadd.f32 %v5714_v33, %v5712_v63  ;;  %v4253_v54 = vadd.f32 %v5726_v39, %v5722_v14  ;;  %v4158_v14 = vld [vmem:[%s5809_s7] ss:$0 sm:$0xff] }
 0x22c   : > { %v4362_v4 = vpop.f32.mrf.mxu1 }
 0x22d   : > { %v4320_v51 = vpop.f32.mrf.mxu0  ;;  %v3485_v22 = vadd.f32 %v4241_v9, %v5692_v40  ;;  %v3558_v32 = vadd.f32 %v4287_v5, %v3493_v10  ;;  %v3563_v39 = vadd.f32 %v4290_v12, %v3498_v25  ;;  %v3501_v57 = vadd.f32 %v4253_v54, %v5700_v36  ;;  %v5836_v36 = vld [vmem:[#allocation3_spill] sm:$0xff] }
 0x22e   : > { %v4363_v55 = vpop.f32.mrf.mxu1  ;;  %v4321_v62 = vadd.f32 %v4320_v51, %v4319_v17 }
 0x22f   : > { %v3550_v58 = vadd.f32 %v4281_v59, %v3485_v22 }
 0x230   : > { %v4365_v34 = vpop.f32.mrf.mxu1 }
 0x231   : > { %v4322_v8 = vpop.f32.mrf.mxu0  ;;  %v3615_v43 = vadd.f32 %v4321_v62, %v3550_v58 }
 0x232   : > { %v4366_v35 = vpop.f32.mrf.mxu1 }
 0x233   : > { %v4323_v61 = vpop.f32.mrf.mxu0  ;;  %v4367_v9 = vadd.f32 %v4366_v35, %v4365_v34 }
 0x235   : > { %v5738_v20 = vpop.f32.mrf.mxu1  ;;  %v4325_v16 = vpop.f32.mrf.mxu0 }
 0x236   : > { %5828 = vst [vmem:[#allocation9_spill] sm:$0xff] %v5738_v20  ;;  %v3482_v20 = vadd.f32 %v4238_v13, %v5688_v19 }
 0x237   : > { %v4326_v28 = vpop.f32.mrf.mxu0  ;;  %v5740_v50 = vpop.f32.mrf.mxu1 }
 0x238   : > { %5829 = vst [vmem:[#allocation10_spill] sm:$0xff] %v5740_v50  ;;  %v4324_v50 = vadd.f32 %v4323_v61, %v4322_v8  ;;  %v4327_v26 = vadd.f32 %v4326_v28, %v4325_v16  ;;  %v3547_v19 = vadd.f32 %v4278_v24, %v3482_v20 }
 0x239   : > { %v5742_v15 = vpop.f32.mrf.mxu1 }
 0x23a   : > { %v4328_v37 = vpop.f32.mrf.mxu0  ;;  %5830 = vst [vmem:[#allocation11_spill] sm:$0xff] %v5742_v15  ;;  %v3555_v15 = vadd.f32 %v4284_v52, %v3490_v56  ;;  %v3506_v56 = vadd.f32 %v5694_v46, %v4256_v44  ;;  %v3612_v40 = vadd.f32 %v4318_v47, %v3547_v19  ;;  %v4364_v52 = vadd.f32 %v4363_v55, %v4362_v4  ;;  %v5835_v55 = vld [vmem:[#allocation8_spill] sm:$0xff] }
 0x23b   : > { %v5747_v41 = vpop.f32.mrf.mxu1  ;;  %v3623_v49 = vadd.f32 %v4327_v26, %v3558_v32 }
 0x23c   : > { %v4329_v2 = vpop.f32.mrf.mxu0  ;;  %5831 = vst [vmem:[#allocation12_spill] sm:$0xff] %v5747_v41  ;;  %v3620_v18 = vadd.f32 %v4324_v50, %v3555_v15  ;;  %v3571_v17 = vadd.f32 %v4296_v27, %v3506_v56  ;;  %v3677_v51 = vadd.f32 %v4358_v38, %v3612_v40  ;;  %v5837_v50 = vld [vmem:[#allocation4_spill] sm:$0xff] }
 0x23d   : > { %v4374_v3 = vpop.f32.mrf.mxu1  ;;  %v4330_v63 = vadd.f32 %v4329_v2, %v4328_v37  ;;  %v3688_v35 = vadd.f32 %v4367_v9, %v3623_v49  ;;  %v4293_v37 = vadd.f32 %v5837_v50, %v5836_v36  ;;  %v3574_v2 = vadd.f32 %v4299_v45, %v3509_v1  ;;  %v5838_v44 = vld [vmem:[#allocation9_spill] sm:$0xff] }
 0x23e   : > { %v5744_v48 = vpop.f32.mrf.mxu0  ;;  %v3685_v46 = vadd.f32 %v4364_v52, %v3620_v18 }
 0x23f   : > { %v4375_v7 = vpop.f32.mrf.mxu1  ;;  %v3628_v15 = vadd.f32 %v4330_v63, %v3563_v39  ;;  %v5839_v47 = vld [vmem:[#allocation10_spill] sm:$0xff]  ;;  %v3566_v5 = vadd.f32 %v4293_v37, %v3501_v57 }
 0x240   : > { %v5749_v21 = vpop.f32.mrf.mxu0  ;;  %v4376_v24 = vadd.f32 %v4375_v7, %v4374_v3  ;;  %v4370_v22 = vadd.f32 %v5839_v47, %v5838_v44 }
 0x241   : > { %v4377_v8 = vpop.f32.mrf.mxu1  ;;  %v4333_v10 = vadd.f32 %v5749_v21, %v5744_v48  ;;  %v5840_v40 = vld [vmem:[#allocation11_spill] sm:$0xff] }
 0x242   : > { %v4334_v0 = vpop.f32.mrf.mxu0  ;;  %v3693_v32 = vadd.f32 %v4370_v22, %v3628_v15 }
 0x243   : > { %v4378_v26 = vpop.f32.mrf.mxu1  ;;  %v3631_v48 = vadd.f32 %v4333_v10, %v3566_v5  ;;  %v5841_v52 = vld [vmem:[#allocation12_spill] sm:$0xff] }
 0x244   : > { %v4335_v41 = vpop.f32.mrf.mxu0  ;;  %v4379_v21 = vadd.f32 %v4378_v26, %v4377_v8  ;;  %v4373_v12 = vadd.f32 %v5841_v52, %v5840_v40 }
 0x245   : > { %v4336_v42 = vadd.f32 %v4335_v41, %v4334_v0  ;;  %v5834_v41 = vld [vmem:[#allocation7_spill] sm:$0xff] }
 0x246   : > { %v4337_v23 = vpop.f32.mrf.mxu0  ;;  %v4361_v30 = vadd.f32 %v5835_v55, %v5834_v41  ;;  %v3696_v38 = vadd.f32 %v4373_v12, %v3631_v48 }
 0x247   : > { %v3636_v61 = vadd.f32 %v4336_v42, %v3571_v17 }
 0x248   : > { %v4338_v31 = vpop.f32.mrf.mxu0  ;;  %v3680_v11 = vadd.f32 %v4361_v30, %v3615_v43 }
 0x249   : > { %v4339_v20 = vadd.f32 %v4338_v31, %v4337_v23  ;;  %v3701_v3 = vadd.f32 %v4376_v24, %v3636_v61 }
 0x24a   : > { %v4510_v33 = vpop.f32.mrf.mxu0 }
 0x24b   : > { %v3750_v4 = vadd.f32 %v4510_v33, %v3685_v46  ;;  %v3639_v18 = vadd.f32 %v4339_v20, %v3574_v2 }
 0x24c   : > { %v3741_v34 = vpop.f32.mrf.mxu0 }
 0x24d   : > { %v3781_v16 = vadd.f32 %v4158_v14, %v3750_v4  ;;  %v3742_v28 = vadd.f32 %v3741_v34, %v3677_v51  ;;  %v3704_v49 = vadd.f32 %v4379_v21, %v3639_v18 }
 0x24e   : > { %v4511_v13 = vpop.f32.mrf.mxu0 }
 0x24f   : > { %3789 = vst [vmem:[%s5781_s25 + $0x10] sm:$0xff] %v3781_v16  ;;  %v3779_v0 = vadd.f32 %v4158_v14, %v3742_v28  ;;  %v3753_v60 = vadd.f32 %v4511_v13, %v3688_v35 }
 0x250   : > { %v3744_v19 = vpop.f32.mrf.mxu0 }
 0x251   : > { %3787 = vst [vmem:[%s5781_s25] sm:$0xff] %v3779_v0  ;;  %v3782_v59 = vadd.f32 %v4158_v14, %v3753_v60  ;;  %v3745_v29 = vadd.f32 %v3744_v19, %v3680_v11 }
 0x252   : > { %v4514_v62 = vpop.f32.mrf.mxu0 }
 0x253   : > { %3790 = vst [vmem:[%s5781_s25 + $0x18] sm:$0xff] %v3782_v59  ;;  %v3780_v23 = vadd.f32 %v4158_v14, %v3745_v29  ;;  %v3766_v25 = vadd.f32 %v4514_v62, %v3701_v3 }
 0x254   : > { %v3757_v56 = vpop.f32.mrf.mxu0 }
 0x255   : > { %3788 = vst [vmem:[%s5781_s25 + $0x8] sm:$0xff] %v3780_v23  ;;  %v3785_v54 = vadd.f32 %v4158_v14, %v3766_v25  ;;  %v3758_v58 = vadd.f32 %v3757_v56, %v3693_v32 }
 0x256   : > { %v4515_v7 = vpop.f32.mrf.mxu0 }
 0x257   : > { %3793 = vst [vmem:[%s5781_s25 + $0x30] sm:$0xff] %v3785_v54  ;;  %v3783_v31 = vadd.f32 %v4158_v14, %v3758_v58  ;;  %v3769_v27 = vadd.f32 %v4515_v7, %v3704_v49 }
 0x258   : > { %v3760_v42 = vpop.f32.mrf.mxu0 }
 0x259   : > { %3791 = vst [vmem:[%s5781_s25 + $0x20] sm:$0xff] %v3783_v31  ;;  %v3786_v46 = vadd.f32 %v4158_v14, %v3769_v27  ;;  %v3761_v1 = vadd.f32 %v3760_v42, %v3696_v38 }
 0x25b   : > { %3794 = vst [vmem:[%s5781_s25 + $0x38] sm:$0xff] %v3786_v46  ;;  %v3784_v43 = vadd.f32 %v4158_v14, %v3761_v1 }
 0x25d   : > { %3792 = vst [vmem:[%s5781_s25 + $0x28] sm:$0xff] %v3784_v43 }
 0x25e PF: > { %s19_s30 = sadd.s32 1, %s4659_s30  }
 0x25f   : > { %p16_p4 = scmp.ge.s32.totalorder %s19_s30, 4  }
 0x261   :  { %18 = sbr.rel (!%p16_p4) target bundleno = 1 (0x1), region = 108 }

</bundles_post_ra>
